<compile_context>
chip_gen: v7x
topology: tpu7x:2x2x1
jax: 0.10.0
libtpu: 0.0.40
codegen_flags: <defaults>
</compile_context>

<pallas_src>
import functools
import numpy as np
import jax
import jax.numpy as jnp
from jax.experimental import pallas as pl
from jax.experimental.pallas import tpu as pltpu

# ---- module hyperparameters (from InputDownsampler.__init__) ----
IN_CHANNELS = 9
OUT_CHANNELS = 16
KD, KH, KW = 3, 5, 5
CONV_PAD = (1, 1, 2)          # (padD, padH, padW)
POOL_K = 3
POOL_STRIDE = (1, 2, 2)       # (strideD, strideH, strideW)
POOL_PAD = (1, 0, 1)          # (padD, padH, padW), padded with -inf
BN_EPS = 1e-5


# ---------------------------------------------------------------------------
# Kernel 1: conv (15 deep-K block-Toeplitz matmuls) + bias + ReLU
#           + lane-dense per-batch BN partial sums (sum, sum of squares)
# ---------------------------------------------------------------------------
def conv_relu_stats_kernel(x_ref, w_ref, b_ref, y_ref, stats_ref):
    # x_ref:     (Dp, Hp, WpC_pad)       bf16  (lane-dense (w, cin), zero padded)
    # w_ref:     (KD*KH, WpC_pad, WoC)   bf16  (banded block-Toeplitz weight slabs)
    # b_ref:     (1, WoC)                f32   (bias tiled per lane)
    # y_ref:     (Do, Ho, WoC)           bf16  (lane-dense conv output, this batch elem)
    # stats_ref: (2, WoC)                f32   (sum over (d, ho) of y and of y*y)
    Do, Ho, WoC = y_ref.shape

    acc = jnp.zeros((Do * Ho, WoC), jnp.float32)
    for kd in range(KD):
        for kh in range(KH):
            # Row (d*Ho + ho) of the patch holds x_pad[d + kd, ho + kh, :]; all output
            # depths share this (kd, kh) weight slab, so M = Do*Ho per MXU push.
            patch = jnp.concatenate(
                [x_ref[d + kd, kh:kh + Ho, :] for d in range(Do)], axis=0)
            acc = acc + jnp.dot(patch, w_ref[kd * KH + kh],
                                preferred_element_type=jnp.float32)

    y = jnp.maximum(acc + b_ref[...], 0.0)                 # bias + ReLU, f32
    for d in range(Do):                                    # bf16 lane-dense intermediate
        y_ref[d] = y[d * Ho:(d + 1) * Ho, :].astype(y_ref.dtype)
    # BN partials from the f32 values (before the bf16 downcast), once per batch elem.
    stats_ref[...] = jnp.concatenate(
        [jnp.sum(y, axis=0, keepdims=True),
         jnp.sum(y * y, axis=0, keepdims=True)], axis=0)


# ---------------------------------------------------------------------------
# Kernel 2: BN affine (train-mode batch stats) fused with a separable 3x3x3
#           MaxPool on the lane-dense (W*C) layout.  Writes the stride-1 W-window
#           maxima (lane-dense); the stride-2 W pick happens in the wrapper.
# ---------------------------------------------------------------------------
def bn_maxpool_kernel(y_ref, scale_ref, shift_ref, o_ref, *, C):
    # y_ref:   (Do, Ho, WoC)   bf16     scale/shift: (1, WoC) f32
    # o_ref:   (Do, Hout, WoC) f32
    Do, Ho, WoC = y_ref.shape
    Hout = o_ref.shape[1]
    neg = jnp.float32(-jnp.inf)
    scale = scale_ref[...]
    shift = shift_ref[...]

    # BN affine once per depth slice, in f32.
    z = [y_ref[d].astype(jnp.float32) * scale + shift for d in range(Do)]

    pad = jnp.full((Hout, C), neg, dtype=jnp.float32)      # -inf W-boundary block

    for d in range(Do):
        # depth window (k=3, stride=1, pad=1): boundaries handled statically.
        zm = z[d]
        if d > 0:
            zm = jnp.maximum(zm, z[d - 1])
        if d < Do - 1:
            zm = jnp.maximum(zm, z[d + 1])
        # H window (k=3, stride=2, no pad): evaluated only at the stride-2 starts.
        rows = []
        for ho in range(Hout):
            r = jnp.maximum(zm[2 * ho:2 * ho + 1, :],
                            jnp.maximum(zm[2 * ho + 1:2 * ho + 2, :],
                                        zm[2 * ho + 2:2 * ho + 3, :]))
            rows.append(r)
        h = jnp.concatenate(rows, axis=0)                  # (Hout, WoC)
        # W window (k=3, pad=1 with -inf) via +-C lane shifts; the shifted copies are
        # a few KB here (pltpu.roll would avoid even that for very wide W).
        left = jnp.concatenate([pad, h[:, :WoC - C]], axis=1)   # value at lane j - C
        right = jnp.concatenate([h[:, C:], pad], axis=1)        # value at lane j + C
        o_ref[d] = jnp.maximum(h, jnp.maximum(left, right))


# ---------------------------------------------------------------------------
# Wrapper
# ---------------------------------------------------------------------------
def input_downsampler_forward(x, w, b, gamma, beta):
    N, Cin, D, H, W = x.shape
    Cout = w.shape[0]
    pd, ph, pw = CONV_PAD
    Dp, Hp, Wp = D + 2 * pd, H + 2 * ph, W + 2 * pw
    Do, Ho, Wo = Dp - KD + 1, Hp - KH + 1, Wp - KW + 1
    WpC = Wp * Cin
    WpC_pad = 128 * pl.cdiv(WpC, 128)        # pad the fused contraction to 128 lanes
    WoC = Wo * Cout

    # ---- lane-dense, zero-padded, bf16 input: (N, Dp, Hp, Wp*Cin -> WpC_pad) ----
    xp = jnp.transpose(x, (0, 2, 3, 4, 1))
    xp = jnp.pad(xp, ((0, 0), (pd, pd), (ph, ph), (pw, pw), (0, 0)))
    xp = xp.reshape(N, Dp, Hp, WpC)
    xp = jnp.pad(xp, ((0, 0), (0, 0), (0, 0), (0, WpC_pad - WpC))).astype(jnp.bfloat16)

    # ---- banded block-Toeplitz weight slabs: (KD*KH, WpC_pad, Wo*Cout) ----
    # W_big[kd, kh, (w_in*Cin + ci), (wo*Cout + co)] = w[co, ci, kd, kh, w_in - wo]
    w_t = jnp.transpose(w, (2, 3, 4, 1, 0)).astype(jnp.float32)   # (KD,KH,KW,Cin,Cout)
    sel = np.zeros((KW, Wp, Wo), np.float32)
    for kw in range(KW):
        sel[kw, np.arange(Wo) + kw, np.arange(Wo)] = 1.0
    w_big = jnp.einsum('kxw,dhkic->dhxiwc', jnp.asarray(sel), w_t)
    w_big = w_big.reshape(KD, KH, WpC, WoC)
    w_big = jnp.pad(w_big, ((0, 0), (0, 0), (0, WpC_pad - WpC), (0, 0)))
    w_big = w_big.reshape(KD * KH, WpC_pad, WoC).astype(jnp.bfloat16)

    b_row = jnp.tile(b.astype(jnp.float32), (Wo,)).reshape(1, WoC)

    params = pltpu.CompilerParams(dimension_semantics=("parallel",),
                                  vmem_limit_bytes=32 * 1024 * 1024)

    y, stats = pl.pallas_call(
        conv_relu_stats_kernel,
        grid=(N,),
        in_specs=[
            pl.BlockSpec((None, Dp, Hp, WpC_pad), lambda n: (n, 0, 0, 0)),
            pl.BlockSpec((KD * KH, WpC_pad, WoC), lambda n: (0, 0, 0)),
            pl.BlockSpec((1, WoC), lambda n: (0, 0)),
        ],
        out_specs=[
            pl.BlockSpec((None, Do, Ho, WoC), lambda n: (n, 0, 0, 0)),
            pl.BlockSpec((None, 2, WoC), lambda n: (n, 0, 0)),
        ],
        out_shape=[
            jax.ShapeDtypeStruct((N, Do, Ho, WoC), jnp.bfloat16),
            jax.ShapeDtypeStruct((N, 2, WoC), jnp.float32),
        ],
        compiler_params=params,
    )(xp, w_big, b_row)

    # ---- global training-mode BN batch stats (biased variance) -> affine fold ----
    count = N * Do * Ho * Wo
    tot = jnp.sum(stats, axis=0).reshape(2, Wo, Cout).sum(axis=1)     # (2, Cout)
    mean = tot[0] / count
    var = tot[1] / count - mean * mean
    scale = gamma.astype(jnp.float32) * jax.lax.rsqrt(var + BN_EPS)
    shift = beta.astype(jnp.float32) - mean * scale
    scale_row = jnp.tile(scale, (Wo,)).reshape(1, WoC)
    shift_row = jnp.tile(shift, (Wo,)).reshape(1, WoC)

    # ---- pooled geometry (PyTorch floor formulas) ----
    Dpool = (Do + 2 * POOL_PAD[0] - POOL_K) // POOL_STRIDE[0] + 1     # == Do
    Hout = (Ho + 2 * POOL_PAD[1] - POOL_K) // POOL_STRIDE[1] + 1

    pooled = pl.pallas_call(
        functools.partial(bn_maxpool_kernel, C=Cout),
        grid=(N,),
        in_specs=[
            pl.BlockSpec((None, Do, Ho, WoC), lambda n: (n, 0, 0, 0)),
            pl.BlockSpec((1, WoC), lambda n: (0, 0)),
            pl.BlockSpec((1, WoC), lambda n: (0, 0)),
        ],
        out_specs=pl.BlockSpec((None, Dpool, Hout, WoC), lambda n: (n, 0, 0, 0)),
        out_shape=jax.ShapeDtypeStruct((N, Dpool, Hout, WoC), jnp.float32),
        compiler_params=params,
    )(y, scale_row, shift_row)

    # Stride-2 W window-start selection (picks Wpool = (Wo-1)//2 + 1 blocks) and the
    # NCDHW transpose: pure layout plumbing on the small pooled tensor, left to XLA.
    out = pooled.reshape(N, Dpool, Hout, Wo, Cout)[:, :, :, ::2, :]
    return jnp.transpose(out, (0, 4, 1, 2, 3))


# ---------------------------------------------------------------------------
# Pure-JAX reference (for correctness check only)
# ---------------------------------------------------------------------------
def reference_forward(x, w, b, gamma, beta):
    y = jax.lax.conv_general_dilated(
        x, w, window_strides=(1, 1, 1),
        padding=((1, 1), (1, 1), (2, 2)),
        dimension_numbers=('NCDHW', 'OIDHW', 'NCDHW'))
    y = y + b.reshape(1, -1, 1, 1, 1)
    y = jnp.maximum(y, 0.0)
    mean = jnp.mean(y, axis=(0, 2, 3, 4), keepdims=True)
    var = jnp.mean((y - mean) ** 2, axis=(0, 2, 3, 4), keepdims=True)
    y = ((y - mean) * jax.lax.rsqrt(var + BN_EPS)
         * gamma.reshape(1, -1, 1, 1, 1) + beta.reshape(1, -1, 1, 1, 1))
    y = jax.lax.reduce_window(
        y, -jnp.inf, jax.lax.max,
        window_dimensions=(1, 1, 3, 3, 3),
        window_strides=(1, 1, 1, 2, 2),
        padding=((0, 0), (0, 0), (1, 1), (0, 0), (1, 1)))
    return y


if __name__ == "__main__":
    key = jax.random.PRNGKey(0)
    k1, k2, k3, k4, k5 = jax.random.split(key, 5)
    N, D, H, W = 2, 4, 10, 8                      # small NCDHW input: (2, 9, 4, 10, 8)
    x = jax.random.normal(k1, (N, IN_CHANNELS, D, H, W), jnp.float32)
    w = 0.05 * jax.random.normal(k2, (OUT_CHANNELS, IN_CHANNELS, KD, KH, KW), jnp.float32)
    b = 0.1 * jax.random.normal(k3, (OUT_CHANNELS,), jnp.float32)
    gamma = 1.0 + 0.1 * jax.random.normal(k4, (OUT_CHANNELS,), jnp.float32)
    beta = 0.1 * jax.random.normal(k5, (OUT_CHANNELS,), jnp.float32)

    # Round x, w to bf16-representable values so the bf16-MXU/f32-acc conv matches the
    # f32 reference tightly; the remaining tolerance is dominated by the bf16 storage
    # of the conv->ReLU intermediate y (|y| <= ~3, std ~0.45 => <= ~0.03 after BN).
    x = x.astype(jnp.bfloat16).astype(jnp.float32)
    w = w.astype(jnp.bfloat16).astype(jnp.float32)

    fwd = jax.jit(input_downsampler_forward)
    out = jax.block_until_ready(fwd(x, w, b, gamma, beta))
    ref = jax.block_until_ready(reference_forward(x, w, b, gamma, beta))

    assert out.shape == ref.shape == (N, OUT_CHANNELS, 4, 3, 4), (out.shape, ref.shape)
    err = float(jnp.max(jnp.abs(out - ref)))
    assert err < 6e-2, f"max abs err {err}"
    print("KERNEL_OK")
</pallas_src>

<mosaic_0001>
module attributes {stable_mosaic.version = 11 : i64} {
  func.func @conv_relu_stats_kernel(%arg0: i32, %arg1: memref<1x6x12x128xbf16, #tpu.memory_space<vmem>>, %arg2: memref<15x128x128xbf16, #tpu.memory_space<vmem>>, %arg3: memref<1x128xf32, #tpu.memory_space<vmem>>, %arg4: memref<1x4x8x128xbf16, #tpu.memory_space<vmem>>, %arg5: memref<1x2x128xf32, #tpu.memory_space<vmem>>) attributes {dimension_semantics = [#tpu.dimension_semantics<parallel>], iteration_bounds = array<i64: 2>, scalar_prefetch = 0 : i64, scratch_operands = 0 : i64, tpu.core_type = #tpu.core_type<tc>, window_params = [{transform_indices = @transform_0, window_bounds = array<i64: 1, 6, 12, 128>}, {pipeline_mode = #tpu.pipeline_mode<synchronous>, transform_indices = @transform_1, window_bounds = array<i64: 15, 128, 128>}, {pipeline_mode = #tpu.pipeline_mode<synchronous>, transform_indices = @transform_2, window_bounds = array<i64: 1, 128>}, {transform_indices = @transform_3, window_bounds = array<i64: 1, 4, 8, 128>}, {transform_indices = @transform_4, window_bounds = array<i64: 1, 2, 128>}]} {
    %cst = arith.constant 0.000000e+00 : f32
    %0 = vector.broadcast %cst : f32 to vector<32x128xf32>
    %c0 = arith.constant 0 : index
    %c0_0 = arith.constant 0 : index
    %c0_1 = arith.constant 0 : index
    %c0_2 = arith.constant 0 : index
    %1 = vector.load %arg1[%c0, %c0_0, %c0_1, %c0_2] : memref<1x6x12x128xbf16, #tpu.memory_space<vmem>>, vector<1x1x8x128xbf16>
    %2 = vector.shape_cast %1 : vector<1x1x8x128xbf16> to vector<8x128xbf16>
    %c0_3 = arith.constant 0 : index
    %c1 = arith.constant 1 : index
    %c0_4 = arith.constant 0 : index
    %c0_5 = arith.constant 0 : index
    %3 = vector.load %arg1[%c0_3, %c1, %c0_4, %c0_5] : memref<1x6x12x128xbf16, #tpu.memory_space<vmem>>, vector<1x1x8x128xbf16>
    %4 = vector.shape_cast %3 : vector<1x1x8x128xbf16> to vector<8x128xbf16>
    %c0_6 = arith.constant 0 : index
    %c2 = arith.constant 2 : index
    %c0_7 = arith.constant 0 : index
    %c0_8 = arith.constant 0 : index
    %5 = vector.load %arg1[%c0_6, %c2, %c0_7, %c0_8] : memref<1x6x12x128xbf16, #tpu.memory_space<vmem>>, vector<1x1x8x128xbf16>
    %6 = vector.shape_cast %5 : vector<1x1x8x128xbf16> to vector<8x128xbf16>
    %c0_9 = arith.constant 0 : index
    %c3 = arith.constant 3 : index
    %c0_10 = arith.constant 0 : index
    %c0_11 = arith.constant 0 : index
    %7 = vector.load %arg1[%c0_9, %c3, %c0_10, %c0_11] : memref<1x6x12x128xbf16, #tpu.memory_space<vmem>>, vector<1x1x8x128xbf16>
    %8 = vector.shape_cast %7 : vector<1x1x8x128xbf16> to vector<8x128xbf16>
    %9 = tpu.concatenate %2, %4, %6, %8 in 0 : vector<8x128xbf16>, vector<8x128xbf16>, vector<8x128xbf16>, vector<8x128xbf16> -> vector<32x128xbf16>
    %c0_12 = arith.constant 0 : index
    %c0_13 = arith.constant 0 : index
    %c0_14 = arith.constant 0 : index
    %10 = vector.load %arg2[%c0_12, %c0_13, %c0_14] : memref<15x128x128xbf16, #tpu.memory_space<vmem>>, vector<1x128x128xbf16>
    %11 = vector.shape_cast %10 : vector<1x128x128xbf16> to vector<128x128xbf16>
    %cst_15 = arith.constant dense<0.000000e+00> : vector<32x128xf32>
    %12 = tpu.matmul %9, %11, %cst_15 {dimension_numbers = #tpu.dot_dimension_numbers<[1], [0], [0], [1], [0, 0, 1, 1], [], []>} : vector<32x128xbf16>, vector<128x128xbf16>, vector<32x128xf32> -> vector<32x128xf32>
    %13 = arith.addf %0, %12 : vector<32x128xf32>
    %c0_16 = arith.constant 0 : index
    %c0_17 = arith.constant 0 : index
    %c1_18 = arith.constant 1 : index
    %c0_19 = arith.constant 0 : index
    %14 = vector.load %arg1[%c0_16, %c0_17, %c1_18, %c0_19] : memref<1x6x12x128xbf16, #tpu.memory_space<vmem>>, vector<1x1x8x128xbf16>
    %15 = vector.shape_cast %14 : vector<1x1x8x128xbf16> to vector<8x128xbf16>
    %c0_20 = arith.constant 0 : index
    %c1_21 = arith.constant 1 : index
    %c1_22 = arith.constant 1 : index
    %c0_23 = arith.constant 0 : index
    %16 = vector.load %arg1[%c0_20, %c1_21, %c1_22, %c0_23] : memref<1x6x12x128xbf16, #tpu.memory_space<vmem>>, vector<1x1x8x128xbf16>
    %17 = vector.shape_cast %16 : vector<1x1x8x128xbf16> to vector<8x128xbf16>
    %c0_24 = arith.constant 0 : index
    %c2_25 = arith.constant 2 : index
    %c1_26 = arith.constant 1 : index
    %c0_27 = arith.constant 0 : index
    %18 = vector.load %arg1[%c0_24, %c2_25, %c1_26, %c0_27] : memref<1x6x12x128xbf16, #tpu.memory_space<vmem>>, vector<1x1x8x128xbf16>
    %19 = vector.shape_cast %18 : vector<1x1x8x128xbf16> to vector<8x128xbf16>
    %c0_28 = arith.constant 0 : index
    %c3_29 = arith.constant 3 : index
    %c1_30 = arith.constant 1 : index
    %c0_31 = arith.constant 0 : index
    %20 = vector.load %arg1[%c0_28, %c3_29, %c1_30, %c0_31] : memref<1x6x12x128xbf16, #tpu.memory_space<vmem>>, vector<1x1x8x128xbf16>
    %21 = vector.shape_cast %20 : vector<1x1x8x128xbf16> to vector<8x128xbf16>
    %22 = tpu.concatenate %15, %17, %19, %21 in 0 : vector<8x128xbf16>, vector<8x128xbf16>, vector<8x128xbf16>, vector<8x128xbf16> -> vector<32x128xbf16>
    %c1_32 = arith.constant 1 : index
    %c0_33 = arith.constant 0 : index
    %c0_34 = arith.constant 0 : index
    %23 = vector.load %arg2[%c1_32, %c0_33, %c0_34] : memref<15x128x128xbf16, #tpu.memory_space<vmem>>, vector<1x128x128xbf16>
    %24 = vector.shape_cast %23 : vector<1x128x128xbf16> to vector<128x128xbf16>
    %cst_35 = arith.constant dense<0.000000e+00> : vector<32x128xf32>
    %25 = tpu.matmul %22, %24, %cst_35 {dimension_numbers = #tpu.dot_dimension_numbers<[1], [0], [0], [1], [0, 0, 1, 1], [], []>} : vector<32x128xbf16>, vector<128x128xbf16>, vector<32x128xf32> -> vector<32x128xf32>
    %26 = arith.addf %13, %25 : vector<32x128xf32>
    %c0_36 = arith.constant 0 : index
    %c0_37 = arith.constant 0 : index
    %c2_38 = arith.constant 2 : index
    %c0_39 = arith.constant 0 : index
    %27 = vector.load %arg1[%c0_36, %c0_37, %c2_38, %c0_39] : memref<1x6x12x128xbf16, #tpu.memory_space<vmem>>, vector<1x1x8x128xbf16>
    %28 = vector.shape_cast %27 : vector<1x1x8x128xbf16> to vector<8x128xbf16>
    %c0_40 = arith.constant 0 : index
    %c1_41 = arith.constant 1 : index
    %c2_42 = arith.constant 2 : index
    %c0_43 = arith.constant 0 : index
    %29 = vector.load %arg1[%c0_40, %c1_41, %c2_42, %c0_43] : memref<1x6x12x128xbf16, #tpu.memory_space<vmem>>, vector<1x1x8x128xbf16>
    %30 = vector.shape_cast %29 : vector<1x1x8x128xbf16> to vector<8x128xbf16>
    %c0_44 = arith.constant 0 : index
    %c2_45 = arith.constant 2 : index
    %c2_46 = arith.constant 2 : index
    %c0_47 = arith.constant 0 : index
    %31 = vector.load %arg1[%c0_44, %c2_45, %c2_46, %c0_47] : memref<1x6x12x128xbf16, #tpu.memory_space<vmem>>, vector<1x1x8x128xbf16>
    %32 = vector.shape_cast %31 : vector<1x1x8x128xbf16> to vector<8x128xbf16>
    %c0_48 = arith.constant 0 : index
    %c3_49 = arith.constant 3 : index
    %c2_50 = arith.constant 2 : index
    %c0_51 = arith.constant 0 : index
    %33 = vector.load %arg1[%c0_48, %c3_49, %c2_50, %c0_51] : memref<1x6x12x128xbf16, #tpu.memory_space<vmem>>, vector<1x1x8x128xbf16>
    %34 = vector.shape_cast %33 : vector<1x1x8x128xbf16> to vector<8x128xbf16>
    %35 = tpu.concatenate %28, %30, %32, %34 in 0 : vector<8x128xbf16>, vector<8x128xbf16>, vector<8x128xbf16>, vector<8x128xbf16> -> vector<32x128xbf16>
    %c2_52 = arith.constant 2 : index
    %c0_53 = arith.constant 0 : index
    %c0_54 = arith.constant 0 : index
    %36 = vector.load %arg2[%c2_52, %c0_53, %c0_54] : memref<15x128x128xbf16, #tpu.memory_space<vmem>>, vector<1x128x128xbf16>
    %37 = vector.shape_cast %36 : vector<1x128x128xbf16> to vector<128x128xbf16>
    %cst_55 = arith.constant dense<0.000000e+00> : vector<32x128xf32>
    %38 = tpu.matmul %35, %37, %cst_55 {dimension_numbers = #tpu.dot_dimension_numbers<[1], [0], [0], [1], [0, 0, 1, 1], [], []>} : vector<32x128xbf16>, vector<128x128xbf16>, vector<32x128xf32> -> vector<32x128xf32>
    %39 = arith.addf %26, %38 : vector<32x128xf32>
    %c0_56 = arith.constant 0 : index
    %c0_57 = arith.constant 0 : index
    %c3_58 = arith.constant 3 : index
    %c0_59 = arith.constant 0 : index
    %40 = vector.load %arg1[%c0_56, %c0_57, %c3_58, %c0_59] : memref<1x6x12x128xbf16, #tpu.memory_space<vmem>>, vector<1x1x8x128xbf16>
    %41 = vector.shape_cast %40 : vector<1x1x8x128xbf16> to vector<8x128xbf16>
    %c0_60 = arith.constant 0 : index
    %c1_61 = arith.constant 1 : index
    %c3_62 = arith.constant 3 : index
    %c0_63 = arith.constant 0 : index
    %42 = vector.load %arg1[%c0_60, %c1_61, %c3_62, %c0_63] : memref<1x6x12x128xbf16, #tpu.memory_space<vmem>>, vector<1x1x8x128xbf16>
    %43 = vector.shape_cast %42 : vector<1x1x8x128xbf16> to vector<8x128xbf16>
    %c0_64 = arith.constant 0 : index
    %c2_65 = arith.constant 2 : index
    %c3_66 = arith.constant 3 : index
    %c0_67 = arith.constant 0 : index
    %44 = vector.load %arg1[%c0_64, %c2_65, %c3_66, %c0_67] : memref<1x6x12x128xbf16, #tpu.memory_space<vmem>>, vector<1x1x8x128xbf16>
    %45 = vector.shape_cast %44 : vector<1x1x8x128xbf16> to vector<8x128xbf16>
    %c0_68 = arith.constant 0 : index
    %c3_69 = arith.constant 3 : index
    %c3_70 = arith.constant 3 : index
    %c0_71 = arith.constant 0 : index
    %46 = vector.load %arg1[%c0_68, %c3_69, %c3_70, %c0_71] : memref<1x6x12x128xbf16, #tpu.memory_space<vmem>>, vector<1x1x8x128xbf16>
    %47 = vector.shape_cast %46 : vector<1x1x8x128xbf16> to vector<8x128xbf16>
    %48 = tpu.concatenate %41, %43, %45, %47 in 0 : vector<8x128xbf16>, vector<8x128xbf16>, vector<8x128xbf16>, vector<8x128xbf16> -> vector<32x128xbf16>
    %c3_72 = arith.constant 3 : index
    %c0_73 = arith.constant 0 : index
    %c0_74 = arith.constant 0 : index
    %49 = vector.load %arg2[%c3_72, %c0_73, %c0_74] : memref<15x128x128xbf16, #tpu.memory_space<vmem>>, vector<1x128x128xbf16>
    %50 = vector.shape_cast %49 : vector<1x128x128xbf16> to vector<128x128xbf16>
    %cst_75 = arith.constant dense<0.000000e+00> : vector<32x128xf32>
    %51 = tpu.matmul %48, %50, %cst_75 {dimension_numbers = #tpu.dot_dimension_numbers<[1], [0], [0], [1], [0, 0, 1, 1], [], []>} : vector<32x128xbf16>, vector<128x128xbf16>, vector<32x128xf32> -> vector<32x128xf32>
    %52 = arith.addf %39, %51 : vector<32x128xf32>
    %c0_76 = arith.constant 0 : index
    %c0_77 = arith.constant 0 : index
    %c4 = arith.constant 4 : index
    %c0_78 = arith.constant 0 : index
    %53 = vector.load %arg1[%c0_76, %c0_77, %c4, %c0_78] : memref<1x6x12x128xbf16, #tpu.memory_space<vmem>>, vector<1x1x8x128xbf16>
    %54 = vector.shape_cast %53 : vector<1x1x8x128xbf16> to vector<8x128xbf16>
    %c0_79 = arith.constant 0 : index
    %c1_80 = arith.constant 1 : index
    %c4_81 = arith.constant 4 : index
    %c0_82 = arith.constant 0 : index
    %55 = vector.load %arg1[%c0_79, %c1_80, %c4_81, %c0_82] : memref<1x6x12x128xbf16, #tpu.memory_space<vmem>>, vector<1x1x8x128xbf16>
    %56 = vector.shape_cast %55 : vector<1x1x8x128xbf16> to vector<8x128xbf16>
    %c0_83 = arith.constant 0 : index
    %c2_84 = arith.constant 2 : index
    %c4_85 = arith.constant 4 : index
    %c0_86 = arith.constant 0 : index
    %57 = vector.load %arg1[%c0_83, %c2_84, %c4_85, %c0_86] : memref<1x6x12x128xbf16, #tpu.memory_space<vmem>>, vector<1x1x8x128xbf16>
    %58 = vector.shape_cast %57 : vector<1x1x8x128xbf16> to vector<8x128xbf16>
    %c0_87 = arith.constant 0 : index
    %c3_88 = arith.constant 3 : index
    %c4_89 = arith.constant 4 : index
    %c0_90 = arith.constant 0 : index
    %59 = vector.load %arg1[%c0_87, %c3_88, %c4_89, %c0_90] : memref<1x6x12x128xbf16, #tpu.memory_space<vmem>>, vector<1x1x8x128xbf16>
    %60 = vector.shape_cast %59 : vector<1x1x8x128xbf16> to vector<8x128xbf16>
    %61 = tpu.concatenate %54, %56, %58, %60 in 0 : vector<8x128xbf16>, vector<8x128xbf16>, vector<8x128xbf16>, vector<8x128xbf16> -> vector<32x128xbf16>
    %c4_91 = arith.constant 4 : index
    %c0_92 = arith.constant 0 : index
    %c0_93 = arith.constant 0 : index
    %62 = vector.load %arg2[%c4_91, %c0_92, %c0_93] : memref<15x128x128xbf16, #tpu.memory_space<vmem>>, vector<1x128x128xbf16>
    %63 = vector.shape_cast %62 : vector<1x128x128xbf16> to vector<128x128xbf16>
    %cst_94 = arith.constant dense<0.000000e+00> : vector<32x128xf32>
    %64 = tpu.matmul %61, %63, %cst_94 {dimension_numbers = #tpu.dot_dimension_numbers<[1], [0], [0], [1], [0, 0, 1, 1], [], []>} : vector<32x128xbf16>, vector<128x128xbf16>, vector<32x128xf32> -> vector<32x128xf32>
    %65 = arith.addf %52, %64 : vector<32x128xf32>
    %c0_95 = arith.constant 0 : index
    %c1_96 = arith.constant 1 : index
    %c0_97 = arith.constant 0 : index
    %c0_98 = arith.constant 0 : index
    %66 = vector.load %arg1[%c0_95, %c1_96, %c0_97, %c0_98] : memref<1x6x12x128xbf16, #tpu.memory_space<vmem>>, vector<1x1x8x128xbf16>
    %67 = vector.shape_cast %66 : vector<1x1x8x128xbf16> to vector<8x128xbf16>
    %c0_99 = arith.constant 0 : index
    %c2_100 = arith.constant 2 : index
    %c0_101 = arith.constant 0 : index
    %c0_102 = arith.constant 0 : index
    %68 = vector.load %arg1[%c0_99, %c2_100, %c0_101, %c0_102] : memref<1x6x12x128xbf16, #tpu.memory_space<vmem>>, vector<1x1x8x128xbf16>
    %69 = vector.shape_cast %68 : vector<1x1x8x128xbf16> to vector<8x128xbf16>
    %c0_103 = arith.constant 0 : index
    %c3_104 = arith.constant 3 : index
    %c0_105 = arith.constant 0 : index
    %c0_106 = arith.constant 0 : index
    %70 = vector.load %arg1[%c0_103, %c3_104, %c0_105, %c0_106] : memref<1x6x12x128xbf16, #tpu.memory_space<vmem>>, vector<1x1x8x128xbf16>
    %71 = vector.shape_cast %70 : vector<1x1x8x128xbf16> to vector<8x128xbf16>
    %c0_107 = arith.constant 0 : index
    %c4_108 = arith.constant 4 : index
    %c0_109 = arith.constant 0 : index
    %c0_110 = arith.constant 0 : index
    %72 = vector.load %arg1[%c0_107, %c4_108, %c0_109, %c0_110] : memref<1x6x12x128xbf16, #tpu.memory_space<vmem>>, vector<1x1x8x128xbf16>
    %73 = vector.shape_cast %72 : vector<1x1x8x128xbf16> to vector<8x128xbf16>
    %74 = tpu.concatenate %67, %69, %71, %73 in 0 : vector<8x128xbf16>, vector<8x128xbf16>, vector<8x128xbf16>, vector<8x128xbf16> -> vector<32x128xbf16>
    %c5 = arith.constant 5 : index
    %c0_111 = arith.constant 0 : index
    %c0_112 = arith.constant 0 : index
    %75 = vector.load %arg2[%c5, %c0_111, %c0_112] : memref<15x128x128xbf16, #tpu.memory_space<vmem>>, vector<1x128x128xbf16>
    %76 = vector.shape_cast %75 : vector<1x128x128xbf16> to vector<128x128xbf16>
    %cst_113 = arith.constant dense<0.000000e+00> : vector<32x128xf32>
    %77 = tpu.matmul %74, %76, %cst_113 {dimension_numbers = #tpu.dot_dimension_numbers<[1], [0], [0], [1], [0, 0, 1, 1], [], []>} : vector<32x128xbf16>, vector<128x128xbf16>, vector<32x128xf32> -> vector<32x128xf32>
    %78 = arith.addf %65, %77 : vector<32x128xf32>
    %c0_114 = arith.constant 0 : index
    %c1_115 = arith.constant 1 : index
    %c1_116 = arith.constant 1 : index
    %c0_117 = arith.constant 0 : index
    %79 = vector.load %arg1[%c0_114, %c1_115, %c1_116, %c0_117] : memref<1x6x12x128xbf16, #tpu.memory_space<vmem>>, vector<1x1x8x128xbf16>
    %80 = vector.shape_cast %79 : vector<1x1x8x128xbf16> to vector<8x128xbf16>
    %c0_118 = arith.constant 0 : index
    %c2_119 = arith.constant 2 : index
    %c1_120 = arith.constant 1 : index
    %c0_121 = arith.constant 0 : index
    %81 = vector.load %arg1[%c0_118, %c2_119, %c1_120, %c0_121] : memref<1x6x12x128xbf16, #tpu.memory_space<vmem>>, vector<1x1x8x128xbf16>
    %82 = vector.shape_cast %81 : vector<1x1x8x128xbf16> to vector<8x128xbf16>
    %c0_122 = arith.constant 0 : index
    %c3_123 = arith.constant 3 : index
    %c1_124 = arith.constant 1 : index
    %c0_125 = arith.constant 0 : index
    %83 = vector.load %arg1[%c0_122, %c3_123, %c1_124, %c0_125] : memref<1x6x12x128xbf16, #tpu.memory_space<vmem>>, vector<1x1x8x128xbf16>
    %84 = vector.shape_cast %83 : vector<1x1x8x128xbf16> to vector<8x128xbf16>
    %c0_126 = arith.constant 0 : index
    %c4_127 = arith.constant 4 : index
    %c1_128 = arith.constant 1 : index
    %c0_129 = arith.constant 0 : index
    %85 = vector.load %arg1[%c0_126, %c4_127, %c1_128, %c0_129] : memref<1x6x12x128xbf16, #tpu.memory_space<vmem>>, vector<1x1x8x128xbf16>
    %86 = vector.shape_cast %85 : vector<1x1x8x128xbf16> to vector<8x128xbf16>
    %87 = tpu.concatenate %80, %82, %84, %86 in 0 : vector<8x128xbf16>, vector<8x128xbf16>, vector<8x128xbf16>, vector<8x128xbf16> -> vector<32x128xbf16>
    %c6 = arith.constant 6 : index
    %c0_130 = arith.constant 0 : index
    %c0_131 = arith.constant 0 : index
    %88 = vector.load %arg2[%c6, %c0_130, %c0_131] : memref<15x128x128xbf16, #tpu.memory_space<vmem>>, vector<1x128x128xbf16>
    %89 = vector.shape_cast %88 : vector<1x128x128xbf16> to vector<128x128xbf16>
    %cst_132 = arith.constant dense<0.000000e+00> : vector<32x128xf32>
    %90 = tpu.matmul %87, %89, %cst_132 {dimension_numbers = #tpu.dot_dimension_numbers<[1], [0], [0], [1], [0, 0, 1, 1], [], []>} : vector<32x128xbf16>, vector<128x128xbf16>, vector<32x128xf32> -> vector<32x128xf32>
    %91 = arith.addf %78, %90 : vector<32x128xf32>
    %c0_133 = arith.constant 0 : index
    %c1_134 = arith.constant 1 : index
    %c2_135 = arith.constant 2 : index
    %c0_136 = arith.constant 0 : index
    %92 = vector.load %arg1[%c0_133, %c1_134, %c2_135, %c0_136] : memref<1x6x12x128xbf16, #tpu.memory_space<vmem>>, vector<1x1x8x128xbf16>
    %93 = vector.shape_cast %92 : vector<1x1x8x128xbf16> to vector<8x128xbf16>
    %c0_137 = arith.constant 0 : index
    %c2_138 = arith.constant 2 : index
    %c2_139 = arith.constant 2 : index
    %c0_140 = arith.constant 0 : index
    %94 = vector.load %arg1[%c0_137, %c2_138, %c2_139, %c0_140] : memref<1x6x12x128xbf16, #tpu.memory_space<vmem>>, vector<1x1x8x128xbf16>
    %95 = vector.shape_cast %94 : vector<1x1x8x128xbf16> to vector<8x128xbf16>
    %c0_141 = arith.constant 0 : index
    %c3_142 = arith.constant 3 : index
    %c2_143 = arith.constant 2 : index
    %c0_144 = arith.constant 0 : index
    %96 = vector.load %arg1[%c0_141, %c3_142, %c2_143, %c0_144] : memref<1x6x12x128xbf16, #tpu.memory_space<vmem>>, vector<1x1x8x128xbf16>
    %97 = vector.shape_cast %96 : vector<1x1x8x128xbf16> to vector<8x128xbf16>
    %c0_145 = arith.constant 0 : index
    %c4_146 = arith.constant 4 : index
    %c2_147 = arith.constant 2 : index
    %c0_148 = arith.constant 0 : index
    %98 = vector.load %arg1[%c0_145, %c4_146, %c2_147, %c0_148] : memref<1x6x12x128xbf16, #tpu.memory_space<vmem>>, vector<1x1x8x128xbf16>
    %99 = vector.shape_cast %98 : vector<1x1x8x128xbf16> to vector<8x128xbf16>
    %100 = tpu.concatenate %93, %95, %97, %99 in 0 : vector<8x128xbf16>, vector<8x128xbf16>, vector<8x128xbf16>, vector<8x128xbf16> -> vector<32x128xbf16>
    %c7 = arith.constant 7 : index
    %c0_149 = arith.constant 0 : index
    %c0_150 = arith.constant 0 : index
    %101 = vector.load %arg2[%c7, %c0_149, %c0_150] : memref<15x128x128xbf16, #tpu.memory_space<vmem>>, vector<1x128x128xbf16>
    %102 = vector.shape_cast %101 : vector<1x128x128xbf16> to vector<128x128xbf16>
    %cst_151 = arith.constant dense<0.000000e+00> : vector<32x128xf32>
    %103 = tpu.matmul %100, %102, %cst_151 {dimension_numbers = #tpu.dot_dimension_numbers<[1], [0], [0], [1], [0, 0, 1, 1], [], []>} : vector<32x128xbf16>, vector<128x128xbf16>, vector<32x128xf32> -> vector<32x128xf32>
    %104 = arith.addf %91, %103 : vector<32x128xf32>
    %c0_152 = arith.constant 0 : index
    %c1_153 = arith.constant 1 : index
    %c3_154 = arith.constant 3 : index
    %c0_155 = arith.constant 0 : index
    %105 = vector.load %arg1[%c0_152, %c1_153, %c3_154, %c0_155] : memref<1x6x12x128xbf16, #tpu.memory_space<vmem>>, vector<1x1x8x128xbf16>
    %106 = vector.shape_cast %105 : vector<1x1x8x128xbf16> to vector<8x128xbf16>
    %c0_156 = arith.constant 0 : index
    %c2_157 = arith.constant 2 : index
    %c3_158 = arith.constant 3 : index
    %c0_159 = arith.constant 0 : index
    %107 = vector.load %arg1[%c0_156, %c2_157, %c3_158, %c0_159] : memref<1x6x12x128xbf16, #tpu.memory_space<vmem>>, vector<1x1x8x128xbf16>
    %108 = vector.shape_cast %107 : vector<1x1x8x128xbf16> to vector<8x128xbf16>
    %c0_160 = arith.constant 0 : index
    %c3_161 = arith.constant 3 : index
    %c3_162 = arith.constant 3 : index
    %c0_163 = arith.constant 0 : index
    %109 = vector.load %arg1[%c0_160, %c3_161, %c3_162, %c0_163] : memref<1x6x12x128xbf16, #tpu.memory_space<vmem>>, vector<1x1x8x128xbf16>
    %110 = vector.shape_cast %109 : vector<1x1x8x128xbf16> to vector<8x128xbf16>
    %c0_164 = arith.constant 0 : index
    %c4_165 = arith.constant 4 : index
    %c3_166 = arith.constant 3 : index
    %c0_167 = arith.constant 0 : index
    %111 = vector.load %arg1[%c0_164, %c4_165, %c3_166, %c0_167] : memref<1x6x12x128xbf16, #tpu.memory_space<vmem>>, vector<1x1x8x128xbf16>
    %112 = vector.shape_cast %111 : vector<1x1x8x128xbf16> to vector<8x128xbf16>
    %113 = tpu.concatenate %106, %108, %110, %112 in 0 : vector<8x128xbf16>, vector<8x128xbf16>, vector<8x128xbf16>, vector<8x128xbf16> -> vector<32x128xbf16>
    %c8 = arith.constant 8 : index
    %c0_168 = arith.constant 0 : index
    %c0_169 = arith.constant 0 : index
    %114 = vector.load %arg2[%c8, %c0_168, %c0_169] : memref<15x128x128xbf16, #tpu.memory_space<vmem>>, vector<1x128x128xbf16>
    %115 = vector.shape_cast %114 : vector<1x128x128xbf16> to vector<128x128xbf16>
    %cst_170 = arith.constant dense<0.000000e+00> : vector<32x128xf32>
    %116 = tpu.matmul %113, %115, %cst_170 {dimension_numbers = #tpu.dot_dimension_numbers<[1], [0], [0], [1], [0, 0, 1, 1], [], []>} : vector<32x128xbf16>, vector<128x128xbf16>, vector<32x128xf32> -> vector<32x128xf32>
    %117 = arith.addf %104, %116 : vector<32x128xf32>
    %c0_171 = arith.constant 0 : index
    %c1_172 = arith.constant 1 : index
    %c4_173 = arith.constant 4 : index
    %c0_174 = arith.constant 0 : index
    %118 = vector.load %arg1[%c0_171, %c1_172, %c4_173, %c0_174] : memref<1x6x12x128xbf16, #tpu.memory_space<vmem>>, vector<1x1x8x128xbf16>
    %119 = vector.shape_cast %118 : vector<1x1x8x128xbf16> to vector<8x128xbf16>
    %c0_175 = arith.constant 0 : index
    %c2_176 = arith.constant 2 : index
    %c4_177 = arith.constant 4 : index
    %c0_178 = arith.constant 0 : index
    %120 = vector.load %arg1[%c0_175, %c2_176, %c4_177, %c0_178] : memref<1x6x12x128xbf16, #tpu.memory_space<vmem>>, vector<1x1x8x128xbf16>
    %121 = vector.shape_cast %120 : vector<1x1x8x128xbf16> to vector<8x128xbf16>
    %c0_179 = arith.constant 0 : index
    %c3_180 = arith.constant 3 : index
    %c4_181 = arith.constant 4 : index
    %c0_182 = arith.constant 0 : index
    %122 = vector.load %arg1[%c0_179, %c3_180, %c4_181, %c0_182] : memref<1x6x12x128xbf16, #tpu.memory_space<vmem>>, vector<1x1x8x128xbf16>
    %123 = vector.shape_cast %122 : vector<1x1x8x128xbf16> to vector<8x128xbf16>
    %c0_183 = arith.constant 0 : index
    %c4_184 = arith.constant 4 : index
    %c4_185 = arith.constant 4 : index
    %c0_186 = arith.constant 0 : index
    %124 = vector.load %arg1[%c0_183, %c4_184, %c4_185, %c0_186] : memref<1x6x12x128xbf16, #tpu.memory_space<vmem>>, vector<1x1x8x128xbf16>
    %125 = vector.shape_cast %124 : vector<1x1x8x128xbf16> to vector<8x128xbf16>
    %126 = tpu.concatenate %119, %121, %123, %125 in 0 : vector<8x128xbf16>, vector<8x128xbf16>, vector<8x128xbf16>, vector<8x128xbf16> -> vector<32x128xbf16>
    %c9 = arith.constant 9 : index
    %c0_187 = arith.constant 0 : index
    %c0_188 = arith.constant 0 : index
    %127 = vector.load %arg2[%c9, %c0_187, %c0_188] : memref<15x128x128xbf16, #tpu.memory_space<vmem>>, vector<1x128x128xbf16>
    %128 = vector.shape_cast %127 : vector<1x128x128xbf16> to vector<128x128xbf16>
    %cst_189 = arith.constant dense<0.000000e+00> : vector<32x128xf32>
    %129 = tpu.matmul %126, %128, %cst_189 {dimension_numbers = #tpu.dot_dimension_numbers<[1], [0], [0], [1], [0, 0, 1, 1], [], []>} : vector<32x128xbf16>, vector<128x128xbf16>, vector<32x128xf32> -> vector<32x128xf32>
    %130 = arith.addf %117, %129 : vector<32x128xf32>
    %c0_190 = arith.constant 0 : index
    %c2_191 = arith.constant 2 : index
    %c0_192 = arith.constant 0 : index
    %c0_193 = arith.constant 0 : index
    %131 = vector.load %arg1[%c0_190, %c2_191, %c0_192, %c0_193] : memref<1x6x12x128xbf16, #tpu.memory_space<vmem>>, vector<1x1x8x128xbf16>
    %132 = vector.shape_cast %131 : vector<1x1x8x128xbf16> to vector<8x128xbf16>
    %c0_194 = arith.constant 0 : index
    %c3_195 = arith.constant 3 : index
    %c0_196 = arith.constant 0 : index
    %c0_197 = arith.constant 0 : index
    %133 = vector.load %arg1[%c0_194, %c3_195, %c0_196, %c0_197] : memref<1x6x12x128xbf16, #tpu.memory_space<vmem>>, vector<1x1x8x128xbf16>
    %134 = vector.shape_cast %133 : vector<1x1x8x128xbf16> to vector<8x128xbf16>
    %c0_198 = arith.constant 0 : index
    %c4_199 = arith.constant 4 : index
    %c0_200 = arith.constant 0 : index
    %c0_201 = arith.constant 0 : index
    %135 = vector.load %arg1[%c0_198, %c4_199, %c0_200, %c0_201] : memref<1x6x12x128xbf16, #tpu.memory_space<vmem>>, vector<1x1x8x128xbf16>
    %136 = vector.shape_cast %135 : vector<1x1x8x128xbf16> to vector<8x128xbf16>
    %c0_202 = arith.constant 0 : index
    %c5_203 = arith.constant 5 : index
    %c0_204 = arith.constant 0 : index
    %c0_205 = arith.constant 0 : index
    %137 = vector.load %arg1[%c0_202, %c5_203, %c0_204, %c0_205] : memref<1x6x12x128xbf16, #tpu.memory_space<vmem>>, vector<1x1x8x128xbf16>
    %138 = vector.shape_cast %137 : vector<1x1x8x128xbf16> to vector<8x128xbf16>
    %139 = tpu.concatenate %132, %134, %136, %138 in 0 : vector<8x128xbf16>, vector<8x128xbf16>, vector<8x128xbf16>, vector<8x128xbf16> -> vector<32x128xbf16>
    %c10 = arith.constant 10 : index
    %c0_206 = arith.constant 0 : index
    %c0_207 = arith.constant 0 : index
    %140 = vector.load %arg2[%c10, %c0_206, %c0_207] : memref<15x128x128xbf16, #tpu.memory_space<vmem>>, vector<1x128x128xbf16>
    %141 = vector.shape_cast %140 : vector<1x128x128xbf16> to vector<128x128xbf16>
    %cst_208 = arith.constant dense<0.000000e+00> : vector<32x128xf32>
    %142 = tpu.matmul %139, %141, %cst_208 {dimension_numbers = #tpu.dot_dimension_numbers<[1], [0], [0], [1], [0, 0, 1, 1], [], []>} : vector<32x128xbf16>, vector<128x128xbf16>, vector<32x128xf32> -> vector<32x128xf32>
    %143 = arith.addf %130, %142 : vector<32x128xf32>
    %c0_209 = arith.constant 0 : index
    %c2_210 = arith.constant 2 : index
    %c1_211 = arith.constant 1 : index
    %c0_212 = arith.constant 0 : index
    %144 = vector.load %arg1[%c0_209, %c2_210, %c1_211, %c0_212] : memref<1x6x12x128xbf16, #tpu.memory_space<vmem>>, vector<1x1x8x128xbf16>
    %145 = vector.shape_cast %144 : vector<1x1x8x128xbf16> to vector<8x128xbf16>
    %c0_213 = arith.constant 0 : index
    %c3_214 = arith.constant 3 : index
    %c1_215 = arith.constant 1 : index
    %c0_216 = arith.constant 0 : index
    %146 = vector.load %arg1[%c0_213, %c3_214, %c1_215, %c0_216] : memref<1x6x12x128xbf16, #tpu.memory_space<vmem>>, vector<1x1x8x128xbf16>
    %147 = vector.shape_cast %146 : vector<1x1x8x128xbf16> to vector<8x128xbf16>
    %c0_217 = arith.constant 0 : index
    %c4_218 = arith.constant 4 : index
    %c1_219 = arith.constant 1 : index
    %c0_220 = arith.constant 0 : index
    %148 = vector.load %arg1[%c0_217, %c4_218, %c1_219, %c0_220] : memref<1x6x12x128xbf16, #tpu.memory_space<vmem>>, vector<1x1x8x128xbf16>
    %149 = vector.shape_cast %148 : vector<1x1x8x128xbf16> to vector<8x128xbf16>
    %c0_221 = arith.constant 0 : index
    %c5_222 = arith.constant 5 : index
    %c1_223 = arith.constant 1 : index
    %c0_224 = arith.constant 0 : index
    %150 = vector.load %arg1[%c0_221, %c5_222, %c1_223, %c0_224] : memref<1x6x12x128xbf16, #tpu.memory_space<vmem>>, vector<1x1x8x128xbf16>
    %151 = vector.shape_cast %150 : vector<1x1x8x128xbf16> to vector<8x128xbf16>
    %152 = tpu.concatenate %145, %147, %149, %151 in 0 : vector<8x128xbf16>, vector<8x128xbf16>, vector<8x128xbf16>, vector<8x128xbf16> -> vector<32x128xbf16>
    %c11 = arith.constant 11 : index
    %c0_225 = arith.constant 0 : index
    %c0_226 = arith.constant 0 : index
    %153 = vector.load %arg2[%c11, %c0_225, %c0_226] : memref<15x128x128xbf16, #tpu.memory_space<vmem>>, vector<1x128x128xbf16>
    %154 = vector.shape_cast %153 : vector<1x128x128xbf16> to vector<128x128xbf16>
    %cst_227 = arith.constant dense<0.000000e+00> : vector<32x128xf32>
    %155 = tpu.matmul %152, %154, %cst_227 {dimension_numbers = #tpu.dot_dimension_numbers<[1], [0], [0], [1], [0, 0, 1, 1], [], []>} : vector<32x128xbf16>, vector<128x128xbf16>, vector<32x128xf32> -> vector<32x128xf32>
    %156 = arith.addf %143, %155 : vector<32x128xf32>
    %c0_228 = arith.constant 0 : index
    %c2_229 = arith.constant 2 : index
    %c2_230 = arith.constant 2 : index
    %c0_231 = arith.constant 0 : index
    %157 = vector.load %arg1[%c0_228, %c2_229, %c2_230, %c0_231] : memref<1x6x12x128xbf16, #tpu.memory_space<vmem>>, vector<1x1x8x128xbf16>
    %158 = vector.shape_cast %157 : vector<1x1x8x128xbf16> to vector<8x128xbf16>
    %c0_232 = arith.constant 0 : index
    %c3_233 = arith.constant 3 : index
    %c2_234 = arith.constant 2 : index
    %c0_235 = arith.constant 0 : index
    %159 = vector.load %arg1[%c0_232, %c3_233, %c2_234, %c0_235] : memref<1x6x12x128xbf16, #tpu.memory_space<vmem>>, vector<1x1x8x128xbf16>
    %160 = vector.shape_cast %159 : vector<1x1x8x128xbf16> to vector<8x128xbf16>
    %c0_236 = arith.constant 0 : index
    %c4_237 = arith.constant 4 : index
    %c2_238 = arith.constant 2 : index
    %c0_239 = arith.constant 0 : index
    %161 = vector.load %arg1[%c0_236, %c4_237, %c2_238, %c0_239] : memref<1x6x12x128xbf16, #tpu.memory_space<vmem>>, vector<1x1x8x128xbf16>
    %162 = vector.shape_cast %161 : vector<1x1x8x128xbf16> to vector<8x128xbf16>
    %c0_240 = arith.constant 0 : index
    %c5_241 = arith.constant 5 : index
    %c2_242 = arith.constant 2 : index
    %c0_243 = arith.constant 0 : index
    %163 = vector.load %arg1[%c0_240, %c5_241, %c2_242, %c0_243] : memref<1x6x12x128xbf16, #tpu.memory_space<vmem>>, vector<1x1x8x128xbf16>
    %164 = vector.shape_cast %163 : vector<1x1x8x128xbf16> to vector<8x128xbf16>
    %165 = tpu.concatenate %158, %160, %162, %164 in 0 : vector<8x128xbf16>, vector<8x128xbf16>, vector<8x128xbf16>, vector<8x128xbf16> -> vector<32x128xbf16>
    %c12 = arith.constant 12 : index
    %c0_244 = arith.constant 0 : index
    %c0_245 = arith.constant 0 : index
    %166 = vector.load %arg2[%c12, %c0_244, %c0_245] : memref<15x128x128xbf16, #tpu.memory_space<vmem>>, vector<1x128x128xbf16>
    %167 = vector.shape_cast %166 : vector<1x128x128xbf16> to vector<128x128xbf16>
    %cst_246 = arith.constant dense<0.000000e+00> : vector<32x128xf32>
    %168 = tpu.matmul %165, %167, %cst_246 {dimension_numbers = #tpu.dot_dimension_numbers<[1], [0], [0], [1], [0, 0, 1, 1], [], []>} : vector<32x128xbf16>, vector<128x128xbf16>, vector<32x128xf32> -> vector<32x128xf32>
    %169 = arith.addf %156, %168 : vector<32x128xf32>
    %c0_247 = arith.constant 0 : index
    %c2_248 = arith.constant 2 : index
    %c3_249 = arith.constant 3 : index
    %c0_250 = arith.constant 0 : index
    %170 = vector.load %arg1[%c0_247, %c2_248, %c3_249, %c0_250] : memref<1x6x12x128xbf16, #tpu.memory_space<vmem>>, vector<1x1x8x128xbf16>
    %171 = vector.shape_cast %170 : vector<1x1x8x128xbf16> to vector<8x128xbf16>
    %c0_251 = arith.constant 0 : index
    %c3_252 = arith.constant 3 : index
    %c3_253 = arith.constant 3 : index
    %c0_254 = arith.constant 0 : index
    %172 = vector.load %arg1[%c0_251, %c3_252, %c3_253, %c0_254] : memref<1x6x12x128xbf16, #tpu.memory_space<vmem>>, vector<1x1x8x128xbf16>
    %173 = vector.shape_cast %172 : vector<1x1x8x128xbf16> to vector<8x128xbf16>
    %c0_255 = arith.constant 0 : index
    %c4_256 = arith.constant 4 : index
    %c3_257 = arith.constant 3 : index
    %c0_258 = arith.constant 0 : index
    %174 = vector.load %arg1[%c0_255, %c4_256, %c3_257, %c0_258] : memref<1x6x12x128xbf16, #tpu.memory_space<vmem>>, vector<1x1x8x128xbf16>
    %175 = vector.shape_cast %174 : vector<1x1x8x128xbf16> to vector<8x128xbf16>
    %c0_259 = arith.constant 0 : index
    %c5_260 = arith.constant 5 : index
    %c3_261 = arith.constant 3 : index
    %c0_262 = arith.constant 0 : index
    %176 = vector.load %arg1[%c0_259, %c5_260, %c3_261, %c0_262] : memref<1x6x12x128xbf16, #tpu.memory_space<vmem>>, vector<1x1x8x128xbf16>
    %177 = vector.shape_cast %176 : vector<1x1x8x128xbf16> to vector<8x128xbf16>
    %178 = tpu.concatenate %171, %173, %175, %177 in 0 : vector<8x128xbf16>, vector<8x128xbf16>, vector<8x128xbf16>, vector<8x128xbf16> -> vector<32x128xbf16>
    %c13 = arith.constant 13 : index
    %c0_263 = arith.constant 0 : index
    %c0_264 = arith.constant 0 : index
    %179 = vector.load %arg2[%c13, %c0_263, %c0_264] : memref<15x128x128xbf16, #tpu.memory_space<vmem>>, vector<1x128x128xbf16>
    %180 = vector.shape_cast %179 : vector<1x128x128xbf16> to vector<128x128xbf16>
    %cst_265 = arith.constant dense<0.000000e+00> : vector<32x128xf32>
    %181 = tpu.matmul %178, %180, %cst_265 {dimension_numbers = #tpu.dot_dimension_numbers<[1], [0], [0], [1], [0, 0, 1, 1], [], []>} : vector<32x128xbf16>, vector<128x128xbf16>, vector<32x128xf32> -> vector<32x128xf32>
    %182 = arith.addf %169, %181 : vector<32x128xf32>
    %c0_266 = arith.constant 0 : index
    %c2_267 = arith.constant 2 : index
    %c4_268 = arith.constant 4 : index
    %c0_269 = arith.constant 0 : index
    %183 = vector.load %arg1[%c0_266, %c2_267, %c4_268, %c0_269] : memref<1x6x12x128xbf16, #tpu.memory_space<vmem>>, vector<1x1x8x128xbf16>
    %184 = vector.shape_cast %183 : vector<1x1x8x128xbf16> to vector<8x128xbf16>
    %c0_270 = arith.constant 0 : index
    %c3_271 = arith.constant 3 : index
    %c4_272 = arith.constant 4 : index
    %c0_273 = arith.constant 0 : index
    %185 = vector.load %arg1[%c0_270, %c3_271, %c4_272, %c0_273] : memref<1x6x12x128xbf16, #tpu.memory_space<vmem>>, vector<1x1x8x128xbf16>
    %186 = vector.shape_cast %185 : vector<1x1x8x128xbf16> to vector<8x128xbf16>
    %c0_274 = arith.constant 0 : index
    %c4_275 = arith.constant 4 : index
    %c4_276 = arith.constant 4 : index
    %c0_277 = arith.constant 0 : index
    %187 = vector.load %arg1[%c0_274, %c4_275, %c4_276, %c0_277] : memref<1x6x12x128xbf16, #tpu.memory_space<vmem>>, vector<1x1x8x128xbf16>
    %188 = vector.shape_cast %187 : vector<1x1x8x128xbf16> to vector<8x128xbf16>
    %c0_278 = arith.constant 0 : index
    %c5_279 = arith.constant 5 : index
    %c4_280 = arith.constant 4 : index
    %c0_281 = arith.constant 0 : index
    %189 = vector.load %arg1[%c0_278, %c5_279, %c4_280, %c0_281] : memref<1x6x12x128xbf16, #tpu.memory_space<vmem>>, vector<1x1x8x128xbf16>
    %190 = vector.shape_cast %189 : vector<1x1x8x128xbf16> to vector<8x128xbf16>
    %191 = tpu.concatenate %184, %186, %188, %190 in 0 : vector<8x128xbf16>, vector<8x128xbf16>, vector<8x128xbf16>, vector<8x128xbf16> -> vector<32x128xbf16>
    %c14 = arith.constant 14 : index
    %c0_282 = arith.constant 0 : index
    %c0_283 = arith.constant 0 : index
    %192 = vector.load %arg2[%c14, %c0_282, %c0_283] : memref<15x128x128xbf16, #tpu.memory_space<vmem>>, vector<1x128x128xbf16>
    %193 = vector.shape_cast %192 : vector<1x128x128xbf16> to vector<128x128xbf16>
    %cst_284 = arith.constant dense<0.000000e+00> : vector<32x128xf32>
    %194 = tpu.matmul %191, %193, %cst_284 {dimension_numbers = #tpu.dot_dimension_numbers<[1], [0], [0], [1], [0, 0, 1, 1], [], []>} : vector<32x128xbf16>, vector<128x128xbf16>, vector<32x128xf32> -> vector<32x128xf32>
    %195 = arith.addf %182, %194 : vector<32x128xf32>
    %c0_285 = arith.constant 0 : index
    %c0_286 = arith.constant 0 : index
    %196 = vector.load %arg3[%c0_285, %c0_286] : memref<1x128xf32, #tpu.memory_space<vmem>>, vector<1x128xf32>
    %197 = vector.broadcast %196 : vector<1x128xf32> to vector<32x128xf32>
    %198 = arith.addf %195, %197 : vector<32x128xf32>
    %cst_287 = arith.constant 0.000000e+00 : f32
    %199 = vector.broadcast %cst_287 : f32 to vector<32x128xf32>
    %200 = arith.maximumf %198, %199 : vector<32x128xf32>
    %201 = vector.extract_strided_slice %200 {offsets = [0, 0], sizes = [8, 128], strides = [1, 1]} : vector<32x128xf32> to vector<8x128xf32>
    %202 = arith.truncf %201 : vector<8x128xf32> to vector<8x128xbf16>
    %c0_288 = arith.constant 0 : index
    %c0_289 = arith.constant 0 : index
    %c0_290 = arith.constant 0 : index
    %c0_291 = arith.constant 0 : index
    %203 = vector.load %arg4[%c0_288, %c0_289, %c0_290, %c0_291] : memref<1x4x8x128xbf16, #tpu.memory_space<vmem>>, vector<1x1x8x128xbf16>
    %204 = vector.shape_cast %203 : vector<1x1x8x128xbf16> to vector<8x128xbf16>
    %205 = vector.shape_cast %202 : vector<8x128xbf16> to vector<1x1x8x128xbf16>
    tpu.vector_store %arg4[%c0_288, %c0_289, %c0_290, %c0_291], %205 {strides = array<i32>} : memref<1x4x8x128xbf16, #tpu.memory_space<vmem>>, vector<1x1x8x128xbf16>,
    %206 = vector.extract_strided_slice %200 {offsets = [8, 0], sizes = [8, 128], strides = [1, 1]} : vector<32x128xf32> to vector<8x128xf32>
    %207 = arith.truncf %206 : vector<8x128xf32> to vector<8x128xbf16>
    %c0_292 = arith.constant 0 : index
    %c1_293 = arith.constant 1 : index
    %c0_294 = arith.constant 0 : index
    %c0_295 = arith.constant 0 : index
    %208 = vector.load %arg4[%c0_292, %c1_293, %c0_294, %c0_295] : memref<1x4x8x128xbf16, #tpu.memory_space<vmem>>, vector<1x1x8x128xbf16>
    %209 = vector.shape_cast %208 : vector<1x1x8x128xbf16> to vector<8x128xbf16>
    %210 = vector.shape_cast %207 : vector<8x128xbf16> to vector<1x1x8x128xbf16>
    tpu.vector_store %arg4[%c0_292, %c1_293, %c0_294, %c0_295], %210 {strides = array<i32>} : memref<1x4x8x128xbf16, #tpu.memory_space<vmem>>, vector<1x1x8x128xbf16>,
    %211 = vector.extract_strided_slice %200 {offsets = [16, 0], sizes = [8, 128], strides = [1, 1]} : vector<32x128xf32> to vector<8x128xf32>
    %212 = arith.truncf %211 : vector<8x128xf32> to vector<8x128xbf16>
    %c0_296 = arith.constant 0 : index
    %c2_297 = arith.constant 2 : index
    %c0_298 = arith.constant 0 : index
    %c0_299 = arith.constant 0 : index
    %213 = vector.load %arg4[%c0_296, %c2_297, %c0_298, %c0_299] : memref<1x4x8x128xbf16, #tpu.memory_space<vmem>>, vector<1x1x8x128xbf16>
    %214 = vector.shape_cast %213 : vector<1x1x8x128xbf16> to vector<8x128xbf16>
    %215 = vector.shape_cast %212 : vector<8x128xbf16> to vector<1x1x8x128xbf16>
    tpu.vector_store %arg4[%c0_296, %c2_297, %c0_298, %c0_299], %215 {strides = array<i32>} : memref<1x4x8x128xbf16, #tpu.memory_space<vmem>>, vector<1x1x8x128xbf16>,
    %216 = vector.extract_strided_slice %200 {offsets = [24, 0], sizes = [8, 128], strides = [1, 1]} : vector<32x128xf32> to vector<8x128xf32>
    %217 = arith.truncf %216 : vector<8x128xf32> to vector<8x128xbf16>
    %c0_300 = arith.constant 0 : index
    %c3_301 = arith.constant 3 : index
    %c0_302 = arith.constant 0 : index
    %c0_303 = arith.constant 0 : index
    %218 = vector.load %arg4[%c0_300, %c3_301, %c0_302, %c0_303] : memref<1x4x8x128xbf16, #tpu.memory_space<vmem>>, vector<1x1x8x128xbf16>
    %219 = vector.shape_cast %218 : vector<1x1x8x128xbf16> to vector<8x128xbf16>
    %220 = vector.shape_cast %217 : vector<8x128xbf16> to vector<1x1x8x128xbf16>
    tpu.vector_store %arg4[%c0_300, %c3_301, %c0_302, %c0_303], %220 {strides = array<i32>} : memref<1x4x8x128xbf16, #tpu.memory_space<vmem>>, vector<1x1x8x128xbf16>,
    %cst_304 = arith.constant dense<0.000000e+00> : vector<128xf32>
    %221 = vector.multi_reduction <add>, %200, %cst_304 [0] : vector<32x128xf32> to vector<128xf32>
    %222 = vector.shape_cast %221 : vector<128xf32> to vector<1x128xf32>
    %223 = arith.mulf %200, %200 : vector<32x128xf32>
    %cst_305 = arith.constant dense<0.000000e+00> : vector<128xf32>
    %224 = vector.multi_reduction <add>, %223, %cst_305 [0] : vector<32x128xf32> to vector<128xf32>
    %225 = vector.shape_cast %224 : vector<128xf32> to vector<1x128xf32>
    %226 = tpu.concatenate %222, %225 in 0 : vector<1x128xf32>, vector<1x128xf32> -> vector<2x128xf32>
    %c0_306 = arith.constant 0 : index
    %c0_307 = arith.constant 0 : index
    %c0_308 = arith.constant 0 : index
    %227 = vector.load %arg5[%c0_306, %c0_307, %c0_308] : memref<1x2x128xf32, #tpu.memory_space<vmem>>, vector<1x2x128xf32>
    %228 = vector.shape_cast %227 : vector<1x2x128xf32> to vector<2x128xf32>
    %229 = vector.shape_cast %226 : vector<2x128xf32> to vector<1x2x128xf32>
    tpu.vector_store %arg5[%c0_306, %c0_307, %c0_308], %229 {strides = array<i32>} : memref<1x2x128xf32, #tpu.memory_space<vmem>>, vector<1x2x128xf32>,
    return
  }
  func.func @transform_0(%arg0: i32) -> (i32, i32, i32, i32) {
    %c0_i32 = arith.constant 0 : i32
    %c0_i32_0 = arith.constant 0 : i32
    %c0_i32_1 = arith.constant 0 : i32
    %c0_i32_2 = arith.constant 0 : i32
    return %arg0, %c0_i32, %c0_i32_0, %c0_i32_1 : i32, i32, i32, i32
  }
  func.func @transform_1(%arg0: i32) -> (i32, i32, i32) {
    %c0_i32 = arith.constant 0 : i32
    %c0_i32_0 = arith.constant 0 : i32
    %c0_i32_1 = arith.constant 0 : i32
    %c0_i32_2 = arith.constant 0 : i32
    return %c0_i32, %c0_i32_0, %c0_i32_1 : i32, i32, i32
  }
  func.func @transform_2(%arg0: i32) -> (i32, i32) {
    %c0_i32 = arith.constant 0 : i32
    %c0_i32_0 = arith.constant 0 : i32
    %c0_i32_1 = arith.constant 0 : i32
    return %c0_i32, %c0_i32_0 : i32, i32
  }
  func.func @transform_3(%arg0: i32) -> (i32, i32, i32, i32) {
    %c0_i32 = arith.constant 0 : i32
    %c0_i32_0 = arith.constant 0 : i32
    %c0_i32_1 = arith.constant 0 : i32
    %c0_i32_2 = arith.constant 0 : i32
    return %arg0, %c0_i32, %c0_i32_0, %c0_i32_1 : i32, i32, i32, i32
  }
  func.func @transform_4(%arg0: i32) -> (i32, i32, i32) {
    %c0_i32 = arith.constant 0 : i32
    %c0_i32_0 = arith.constant 0 : i32
    %c0_i32_1 = arith.constant 0 : i32
    return %arg0, %c0_i32, %c0_i32_0 : i32, i32, i32
  }
}

module attributes {stable_mosaic.version = 11 : i64} {
  func.func @bn_maxpool_kernel(%arg0: i32, %arg1: memref<1x4x8x128xbf16, #tpu.memory_space<vmem>>, %arg2: memref<1x128xf32, #tpu.memory_space<vmem>>, %arg3: memref<1x128xf32, #tpu.memory_space<vmem>>, %arg4: memref<1x4x3x128xf32, #tpu.memory_space<vmem>>) attributes {dimension_semantics = [#tpu.dimension_semantics<parallel>], iteration_bounds = array<i64: 2>, scalar_prefetch = 0 : i64, scratch_operands = 0 : i64, tpu.core_type = #tpu.core_type<tc>, window_params = [{transform_indices = @transform_0, window_bounds = array<i64: 1, 4, 8, 128>}, {pipeline_mode = #tpu.pipeline_mode<synchronous>, transform_indices = @transform_1, window_bounds = array<i64: 1, 128>}, {pipeline_mode = #tpu.pipeline_mode<synchronous>, transform_indices = @transform_2, window_bounds = array<i64: 1, 128>}, {transform_indices = @transform_3, window_bounds = array<i64: 1, 4, 3, 128>}]} {
    %c0 = arith.constant 0 : index
    %c0_0 = arith.constant 0 : index
    %0 = vector.load %arg2[%c0, %c0_0] : memref<1x128xf32, #tpu.memory_space<vmem>>, vector<1x128xf32>
    %c0_1 = arith.constant 0 : index
    %c0_2 = arith.constant 0 : index
    %1 = vector.load %arg3[%c0_1, %c0_2] : memref<1x128xf32, #tpu.memory_space<vmem>>, vector<1x128xf32>
    %c0_3 = arith.constant 0 : index
    %c0_4 = arith.constant 0 : index
    %c0_5 = arith.constant 0 : index
    %c0_6 = arith.constant 0 : index
    %2 = vector.load %arg1[%c0_3, %c0_4, %c0_5, %c0_6] : memref<1x4x8x128xbf16, #tpu.memory_space<vmem>>, vector<1x1x8x128xbf16>
    %3 = vector.shape_cast %2 : vector<1x1x8x128xbf16> to vector<8x128xbf16>
    %4 = arith.extf %3 : vector<8x128xbf16> to vector<8x128xf32>
    %5 = vector.broadcast %0 : vector<1x128xf32> to vector<8x128xf32>
    %6 = arith.mulf %4, %5 : vector<8x128xf32>
    %7 = vector.broadcast %1 : vector<1x128xf32> to vector<8x128xf32>
    %8 = arith.addf %6, %7 : vector<8x128xf32>
    %c0_7 = arith.constant 0 : index
    %c1 = arith.constant 1 : index
    %c0_8 = arith.constant 0 : index
    %c0_9 = arith.constant 0 : index
    %9 = vector.load %arg1[%c0_7, %c1, %c0_8, %c0_9] : memref<1x4x8x128xbf16, #tpu.memory_space<vmem>>, vector<1x1x8x128xbf16>
    %10 = vector.shape_cast %9 : vector<1x1x8x128xbf16> to vector<8x128xbf16>
    %11 = arith.extf %10 : vector<8x128xbf16> to vector<8x128xf32>
    %12 = vector.broadcast %0 : vector<1x128xf32> to vector<8x128xf32>
    %13 = arith.mulf %11, %12 : vector<8x128xf32>
    %14 = vector.broadcast %1 : vector<1x128xf32> to vector<8x128xf32>
    %15 = arith.addf %13, %14 : vector<8x128xf32>
    %c0_10 = arith.constant 0 : index
    %c2 = arith.constant 2 : index
    %c0_11 = arith.constant 0 : index
    %c0_12 = arith.constant 0 : index
    %16 = vector.load %arg1[%c0_10, %c2, %c0_11, %c0_12] : memref<1x4x8x128xbf16, #tpu.memory_space<vmem>>, vector<1x1x8x128xbf16>
    %17 = vector.shape_cast %16 : vector<1x1x8x128xbf16> to vector<8x128xbf16>
    %18 = arith.extf %17 : vector<8x128xbf16> to vector<8x128xf32>
    %19 = vector.broadcast %0 : vector<1x128xf32> to vector<8x128xf32>
    %20 = arith.mulf %18, %19 : vector<8x128xf32>
    %21 = vector.broadcast %1 : vector<1x128xf32> to vector<8x128xf32>
    %22 = arith.addf %20, %21 : vector<8x128xf32>
    %c0_13 = arith.constant 0 : index
    %c3 = arith.constant 3 : index
    %c0_14 = arith.constant 0 : index
    %c0_15 = arith.constant 0 : index
    %23 = vector.load %arg1[%c0_13, %c3, %c0_14, %c0_15] : memref<1x4x8x128xbf16, #tpu.memory_space<vmem>>, vector<1x1x8x128xbf16>
    %24 = vector.shape_cast %23 : vector<1x1x8x128xbf16> to vector<8x128xbf16>
    %25 = arith.extf %24 : vector<8x128xbf16> to vector<8x128xf32>
    %26 = vector.broadcast %0 : vector<1x128xf32> to vector<8x128xf32>
    %27 = arith.mulf %25, %26 : vector<8x128xf32>
    %28 = vector.broadcast %1 : vector<1x128xf32> to vector<8x128xf32>
    %29 = arith.addf %27, %28 : vector<8x128xf32>
    %cst = arith.constant 0xFF800000 : f32
    %30 = vector.broadcast %cst : f32 to vector<3x16xf32>
    %31 = arith.maximumf %8, %15 : vector<8x128xf32>
    %32 = vector.extract_strided_slice %31 {offsets = [0, 0], sizes = [1, 128], strides = [1, 1]} : vector<8x128xf32> to vector<1x128xf32>
    %33 = vector.extract_strided_slice %31 {offsets = [1, 0], sizes = [1, 128], strides = [1, 1]} : vector<8x128xf32> to vector<1x128xf32>
    %34 = vector.extract_strided_slice %31 {offsets = [2, 0], sizes = [1, 128], strides = [1, 1]} : vector<8x128xf32> to vector<1x128xf32>
    %35 = arith.maximumf %33, %34 : vector<1x128xf32>
    %36 = arith.maximumf %32, %35 : vector<1x128xf32>
    %37 = vector.extract_strided_slice %31 {offsets = [2, 0], sizes = [1, 128], strides = [1, 1]} : vector<8x128xf32> to vector<1x128xf32>
    %38 = vector.extract_strided_slice %31 {offsets = [3, 0], sizes = [1, 128], strides = [1, 1]} : vector<8x128xf32> to vector<1x128xf32>
    %39 = vector.extract_strided_slice %31 {offsets = [4, 0], sizes = [1, 128], strides = [1, 1]} : vector<8x128xf32> to vector<1x128xf32>
    %40 = arith.maximumf %38, %39 : vector<1x128xf32>
    %41 = arith.maximumf %37, %40 : vector<1x128xf32>
    %42 = vector.extract_strided_slice %31 {offsets = [4, 0], sizes = [1, 128], strides = [1, 1]} : vector<8x128xf32> to vector<1x128xf32>
    %43 = vector.extract_strided_slice %31 {offsets = [5, 0], sizes = [1, 128], strides = [1, 1]} : vector<8x128xf32> to vector<1x128xf32>
    %44 = vector.extract_strided_slice %31 {offsets = [6, 0], sizes = [1, 128], strides = [1, 1]} : vector<8x128xf32> to vector<1x128xf32>
    %45 = arith.maximumf %43, %44 : vector<1x128xf32>
    %46 = arith.maximumf %42, %45 : vector<1x128xf32>
    %47 = tpu.concatenate %36, %41, %46 in 0 : vector<1x128xf32>, vector<1x128xf32>, vector<1x128xf32> -> vector<3x128xf32>
    %48 = vector.extract_strided_slice %47 {offsets = [0, 0], sizes = [3, 112], strides = [1, 1]} : vector<3x128xf32> to vector<3x112xf32>
    %49 = tpu.concatenate %30, %48 in 1 : vector<3x16xf32>, vector<3x112xf32> -> vector<3x128xf32>
    %50 = vector.extract_strided_slice %47 {offsets = [0, 16], sizes = [3, 112], strides = [1, 1]} : vector<3x128xf32> to vector<3x112xf32>
    %51 = tpu.concatenate %50, %30 in 1 : vector<3x112xf32>, vector<3x16xf32> -> vector<3x128xf32>
    %52 = arith.maximumf %49, %51 : vector<3x128xf32>
    %53 = arith.maximumf %47, %52 : vector<3x128xf32>
    %c0_16 = arith.constant 0 : index
    %c0_17 = arith.constant 0 : index
    %c0_18 = arith.constant 0 : index
    %c0_19 = arith.constant 0 : index
    %54 = vector.load %arg4[%c0_16, %c0_17, %c0_18, %c0_19] : memref<1x4x3x128xf32, #tpu.memory_space<vmem>>, vector<1x1x3x128xf32>
    %55 = vector.shape_cast %54 : vector<1x1x3x128xf32> to vector<3x128xf32>
    %56 = vector.shape_cast %53 : vector<3x128xf32> to vector<1x1x3x128xf32>
    tpu.vector_store %arg4[%c0_16, %c0_17, %c0_18, %c0_19], %56 {strides = array<i32>} : memref<1x4x3x128xf32, #tpu.memory_space<vmem>>, vector<1x1x3x128xf32>,
    %57 = arith.maximumf %15, %8 : vector<8x128xf32>
    %58 = arith.maximumf %57, %22 : vector<8x128xf32>
    %59 = vector.extract_strided_slice %58 {offsets = [0, 0], sizes = [1, 128], strides = [1, 1]} : vector<8x128xf32> to vector<1x128xf32>
    %60 = vector.extract_strided_slice %58 {offsets = [1, 0], sizes = [1, 128], strides = [1, 1]} : vector<8x128xf32> to vector<1x128xf32>
    %61 = vector.extract_strided_slice %58 {offsets = [2, 0], sizes = [1, 128], strides = [1, 1]} : vector<8x128xf32> to vector<1x128xf32>
    %62 = arith.maximumf %60, %61 : vector<1x128xf32>
    %63 = arith.maximumf %59, %62 : vector<1x128xf32>
    %64 = vector.extract_strided_slice %58 {offsets = [2, 0], sizes = [1, 128], strides = [1, 1]} : vector<8x128xf32> to vector<1x128xf32>
    %65 = vector.extract_strided_slice %58 {offsets = [3, 0], sizes = [1, 128], strides = [1, 1]} : vector<8x128xf32> to vector<1x128xf32>
    %66 = vector.extract_strided_slice %58 {offsets = [4, 0], sizes = [1, 128], strides = [1, 1]} : vector<8x128xf32> to vector<1x128xf32>
    %67 = arith.maximumf %65, %66 : vector<1x128xf32>
    %68 = arith.maximumf %64, %67 : vector<1x128xf32>
    %69 = vector.extract_strided_slice %58 {offsets = [4, 0], sizes = [1, 128], strides = [1, 1]} : vector<8x128xf32> to vector<1x128xf32>
    %70 = vector.extract_strided_slice %58 {offsets = [5, 0], sizes = [1, 128], strides = [1, 1]} : vector<8x128xf32> to vector<1x128xf32>
    %71 = vector.extract_strided_slice %58 {offsets = [6, 0], sizes = [1, 128], strides = [1, 1]} : vector<8x128xf32> to vector<1x128xf32>
    %72 = arith.maximumf %70, %71 : vector<1x128xf32>
    %73 = arith.maximumf %69, %72 : vector<1x128xf32>
    %74 = tpu.concatenate %63, %68, %73 in 0 : vector<1x128xf32>, vector<1x128xf32>, vector<1x128xf32> -> vector<3x128xf32>
    %75 = vector.extract_strided_slice %74 {offsets = [0, 0], sizes = [3, 112], strides = [1, 1]} : vector<3x128xf32> to vector<3x112xf32>
    %76 = tpu.concatenate %30, %75 in 1 : vector<3x16xf32>, vector<3x112xf32> -> vector<3x128xf32>
    %77 = vector.extract_strided_slice %74 {offsets = [0, 16], sizes = [3, 112], strides = [1, 1]} : vector<3x128xf32> to vector<3x112xf32>
    %78 = tpu.concatenate %77, %30 in 1 : vector<3x112xf32>, vector<3x16xf32> -> vector<3x128xf32>
    %79 = arith.maximumf %76, %78 : vector<3x128xf32>
    %80 = arith.maximumf %74, %79 : vector<3x128xf32>
    %c0_20 = arith.constant 0 : index
    %c1_21 = arith.constant 1 : index
    %c0_22 = arith.constant 0 : index
    %c0_23 = arith.constant 0 : index
    %81 = vector.load %arg4[%c0_20, %c1_21, %c0_22, %c0_23] : memref<1x4x3x128xf32, #tpu.memory_space<vmem>>, vector<1x1x3x128xf32>
    %82 = vector.shape_cast %81 : vector<1x1x3x128xf32> to vector<3x128xf32>
    %83 = vector.shape_cast %80 : vector<3x128xf32> to vector<1x1x3x128xf32>
    tpu.vector_store %arg4[%c0_20, %c1_21, %c0_22, %c0_23], %83 {strides = array<i32>} : memref<1x4x3x128xf32, #tpu.memory_space<vmem>>, vector<1x1x3x128xf32>,
    %84 = arith.maximumf %22, %15 : vector<8x128xf32>
    %85 = arith.maximumf %84, %29 : vector<8x128xf32>
    %86 = vector.extract_strided_slice %85 {offsets = [0, 0], sizes = [1, 128], strides = [1, 1]} : vector<8x128xf32> to vector<1x128xf32>
    %87 = vector.extract_strided_slice %85 {offsets = [1, 0], sizes = [1, 128], strides = [1, 1]} : vector<8x128xf32> to vector<1x128xf32>
    %88 = vector.extract_strided_slice %85 {offsets = [2, 0], sizes = [1, 128], strides = [1, 1]} : vector<8x128xf32> to vector<1x128xf32>
    %89 = arith.maximumf %87, %88 : vector<1x128xf32>
    %90 = arith.maximumf %86, %89 : vector<1x128xf32>
    %91 = vector.extract_strided_slice %85 {offsets = [2, 0], sizes = [1, 128], strides = [1, 1]} : vector<8x128xf32> to vector<1x128xf32>
    %92 = vector.extract_strided_slice %85 {offsets = [3, 0], sizes = [1, 128], strides = [1, 1]} : vector<8x128xf32> to vector<1x128xf32>
    %93 = vector.extract_strided_slice %85 {offsets = [4, 0], sizes = [1, 128], strides = [1, 1]} : vector<8x128xf32> to vector<1x128xf32>
    %94 = arith.maximumf %92, %93 : vector<1x128xf32>
    %95 = arith.maximumf %91, %94 : vector<1x128xf32>
    %96 = vector.extract_strided_slice %85 {offsets = [4, 0], sizes = [1, 128], strides = [1, 1]} : vector<8x128xf32> to vector<1x128xf32>
    %97 = vector.extract_strided_slice %85 {offsets = [5, 0], sizes = [1, 128], strides = [1, 1]} : vector<8x128xf32> to vector<1x128xf32>
    %98 = vector.extract_strided_slice %85 {offsets = [6, 0], sizes = [1, 128], strides = [1, 1]} : vector<8x128xf32> to vector<1x128xf32>
    %99 = arith.maximumf %97, %98 : vector<1x128xf32>
    %100 = arith.maximumf %96, %99 : vector<1x128xf32>
    %101 = tpu.concatenate %90, %95, %100 in 0 : vector<1x128xf32>, vector<1x128xf32>, vector<1x128xf32> -> vector<3x128xf32>
    %102 = vector.extract_strided_slice %101 {offsets = [0, 0], sizes = [3, 112], strides = [1, 1]} : vector<3x128xf32> to vector<3x112xf32>
    %103 = tpu.concatenate %30, %102 in 1 : vector<3x16xf32>, vector<3x112xf32> -> vector<3x128xf32>
    %104 = vector.extract_strided_slice %101 {offsets = [0, 16], sizes = [3, 112], strides = [1, 1]} : vector<3x128xf32> to vector<3x112xf32>
    %105 = tpu.concatenate %104, %30 in 1 : vector<3x112xf32>, vector<3x16xf32> -> vector<3x128xf32>
    %106 = arith.maximumf %103, %105 : vector<3x128xf32>
    %107 = arith.maximumf %101, %106 : vector<3x128xf32>
    %c0_24 = arith.constant 0 : index
    %c2_25 = arith.constant 2 : index
    %c0_26 = arith.constant 0 : index
    %c0_27 = arith.constant 0 : index
    %108 = vector.load %arg4[%c0_24, %c2_25, %c0_26, %c0_27] : memref<1x4x3x128xf32, #tpu.memory_space<vmem>>, vector<1x1x3x128xf32>
    %109 = vector.shape_cast %108 : vector<1x1x3x128xf32> to vector<3x128xf32>
    %110 = vector.shape_cast %107 : vector<3x128xf32> to vector<1x1x3x128xf32>
    tpu.vector_store %arg4[%c0_24, %c2_25, %c0_26, %c0_27], %110 {strides = array<i32>} : memref<1x4x3x128xf32, #tpu.memory_space<vmem>>, vector<1x1x3x128xf32>,
    %111 = arith.maximumf %29, %22 : vector<8x128xf32>
    %112 = vector.extract_strided_slice %111 {offsets = [0, 0], sizes = [1, 128], strides = [1, 1]} : vector<8x128xf32> to vector<1x128xf32>
    %113 = vector.extract_strided_slice %111 {offsets = [1, 0], sizes = [1, 128], strides = [1, 1]} : vector<8x128xf32> to vector<1x128xf32>
    %114 = vector.extract_strided_slice %111 {offsets = [2, 0], sizes = [1, 128], strides = [1, 1]} : vector<8x128xf32> to vector<1x128xf32>
    %115 = arith.maximumf %113, %114 : vector<1x128xf32>
    %116 = arith.maximumf %112, %115 : vector<1x128xf32>
    %117 = vector.extract_strided_slice %111 {offsets = [2, 0], sizes = [1, 128], strides = [1, 1]} : vector<8x128xf32> to vector<1x128xf32>
    %118 = vector.extract_strided_slice %111 {offsets = [3, 0], sizes = [1, 128], strides = [1, 1]} : vector<8x128xf32> to vector<1x128xf32>
    %119 = vector.extract_strided_slice %111 {offsets = [4, 0], sizes = [1, 128], strides = [1, 1]} : vector<8x128xf32> to vector<1x128xf32>
    %120 = arith.maximumf %118, %119 : vector<1x128xf32>
    %121 = arith.maximumf %117, %120 : vector<1x128xf32>
    %122 = vector.extract_strided_slice %111 {offsets = [4, 0], sizes = [1, 128], strides = [1, 1]} : vector<8x128xf32> to vector<1x128xf32>
    %123 = vector.extract_strided_slice %111 {offsets = [5, 0], sizes = [1, 128], strides = [1, 1]} : vector<8x128xf32> to vector<1x128xf32>
    %124 = vector.extract_strided_slice %111 {offsets = [6, 0], sizes = [1, 128], strides = [1, 1]} : vector<8x128xf32> to vector<1x128xf32>
    %125 = arith.maximumf %123, %124 : vector<1x128xf32>
    %126 = arith.maximumf %122, %125 : vector<1x128xf32>
    %127 = tpu.concatenate %116, %121, %126 in 0 : vector<1x128xf32>, vector<1x128xf32>, vector<1x128xf32> -> vector<3x128xf32>
    %128 = vector.extract_strided_slice %127 {offsets = [0, 0], sizes = [3, 112], strides = [1, 1]} : vector<3x128xf32> to vector<3x112xf32>
    %129 = tpu.concatenate %30, %128 in 1 : vector<3x16xf32>, vector<3x112xf32> -> vector<3x128xf32>
    %130 = vector.extract_strided_slice %127 {offsets = [0, 16], sizes = [3, 112], strides = [1, 1]} : vector<3x128xf32> to vector<3x112xf32>
    %131 = tpu.concatenate %130, %30 in 1 : vector<3x112xf32>, vector<3x16xf32> -> vector<3x128xf32>
    %132 = arith.maximumf %129, %131 : vector<3x128xf32>
    %133 = arith.maximumf %127, %132 : vector<3x128xf32>
    %c0_28 = arith.constant 0 : index
    %c3_29 = arith.constant 3 : index
    %c0_30 = arith.constant 0 : index
    %c0_31 = arith.constant 0 : index
    %134 = vector.load %arg4[%c0_28, %c3_29, %c0_30, %c0_31] : memref<1x4x3x128xf32, #tpu.memory_space<vmem>>, vector<1x1x3x128xf32>
    %135 = vector.shape_cast %134 : vector<1x1x3x128xf32> to vector<3x128xf32>
    %136 = vector.shape_cast %133 : vector<3x128xf32> to vector<1x1x3x128xf32>
    tpu.vector_store %arg4[%c0_28, %c3_29, %c0_30, %c0_31], %136 {strides = array<i32>} : memref<1x4x3x128xf32, #tpu.memory_space<vmem>>, vector<1x1x3x128xf32>,
    return
  }
  func.func @transform_0(%arg0: i32) -> (i32, i32, i32, i32) {
    %c0_i32 = arith.constant 0 : i32
    %c0_i32_0 = arith.constant 0 : i32
    %c0_i32_1 = arith.constant 0 : i32
    %c0_i32_2 = arith.constant 0 : i32
    return %arg0, %c0_i32, %c0_i32_0, %c0_i32_1 : i32, i32, i32, i32
  }
  func.func @transform_1(%arg0: i32) -> (i32, i32) {
    %c0_i32 = arith.constant 0 : i32
    %c0_i32_0 = arith.constant 0 : i32
    %c0_i32_1 = arith.constant 0 : i32
    return %c0_i32, %c0_i32_0 : i32, i32
  }
  func.func @transform_2(%arg0: i32) -> (i32, i32) {
    %c0_i32 = arith.constant 0 : i32
    %c0_i32_0 = arith.constant 0 : i32
    %c0_i32_1 = arith.constant 0 : i32
    return %c0_i32, %c0_i32_0 : i32, i32
  }
  func.func @transform_3(%arg0: i32) -> (i32, i32, i32, i32) {
    %c0_i32 = arith.constant 0 : i32
    %c0_i32_0 = arith.constant 0 : i32
    %c0_i32_1 = arith.constant 0 : i32
    %c0_i32_2 = arith.constant 0 : i32
    return %arg0, %c0_i32, %c0_i32_0, %c0_i32_1 : i32, i32, i32, i32
  }
}

</mosaic_0001>

<bundles_post_ra>
// kernel: tile.18
= control target key start
LH: loop header
LB: loop body
LE: loop exit
PB: predicated region body
PF: predicated region fallthrough
CT: control target
= control target key end

     0   :  { %s22_s0 = inlined_call_operand.vmem [shape: f32[16], index: 0, kind: input, shape index: {}]   ;;  %s23_s1 = inlined_call_operand.vmem [shape: f32[8,16], index: 1, kind: output, shape index: {}]  }
   0x1   :  { %v4_v0 = vld [vmem:[%s22_s0] ss:$0 sm:$0xff] }
   0x2   :  { %5 = vst [vmem:[%s23_s1] sm:$0xff] %v4_v0 }

// kernel: tile.19
= control target key start
LH: loop header
LB: loop body
LE: loop exit
PB: predicated region body
PF: predicated region fallthrough
CT: control target
= control target key end

     0   :  { %s67_s10 = smov 112   ;;  %s68_s11 = smov 80   ;;  %vm3_vm0 = vcmask 130048   ;;  %vm9_vm1 = vcmask 1048448   ;;  %vm15_vm2 = vcmask 917248   ;;  %vm21_vm3 = vcmask 786048   ;;  %s111_s0 = inlined_call_operand.vmem [shape: f32[8,16], index: 0, kind: input, shape index: {}]   ;;  %s112_s1 = inlined_call_operand.vmem [shape: f32[1,128], index: 1, kind: output, shape index: {}]  }
   0x1   :  { %v53_v0 = vld [vmem:[%s111_s0 + $0x7] sm:$0x1]   ;;  %v55_v1 = vld [vmem:[%s111_s0 + $0x5] sm:$0x1]   ;;  %v54_v2 = vld [vmem:[%s111_s0 + $0x6] sm:$0x1]  }
   0x2   :  { %7 = vrot.lane.b32.xlu0 %v53_v0, %s67_s10  ;;  %19 = vrot.lane.b32.xlu1 %v55_v1, %s68_s11  ;;  %v56_v3 = vld [vmem:[%s111_s0 + $0x4] sm:$0x1]   ;;  %v2_v4 = vld [vmem:[%s111_s0] sm:$0x1]   ;;  %s69_s18 = smov 96   ;;  %s70_s19 = smov 64  }
   0x3   :  { %4 = vst.msk [vmem:[#allocation0] sm:$0x1] %vm3_vm0, %v2_v4   ;;  %v57_v5 = vld [vmem:[%s111_s0 + $0x3] sm:$0x1]   ;;  %v58_v6 = vld [vmem:[%s111_s0 + $0x2] sm:$0x1]  }
   0x4   :  { %s71_s24 = smov 48   ;;  %s72_s25 = smov 32   ;;  %v59_v7 = vld [vmem:[%s111_s0 + $0x1] sm:$0x1]   ;;  %vm27_vm4 = vcmask 654848   ;;  %vm33_vm5 = vcmask 523648  }
   0x5   :  { %s73_s0 = smov 16   ;;  %vm39_vm6 = vcmask 392448   ;;  %vm45_vm7 = vcmask 261248  }
   0x6   :  { %13 = vrot.lane.b32.xlu0 %v54_v2, %s69_s18  ;;  %25 = vrot.lane.b32.xlu1 %v56_v3, %s70_s19 }
   0xa   :  { %31 = vrot.lane.b32.xlu0 %v57_v5, %s71_s24  ;;  %37 = vrot.lane.b32.xlu1 %v58_v6, %s72_s25 }
   0xe   :  { %43 = vrot.lane.b32.xlu0 %v59_v7, %s73_s0 }
  0x74   :  { %v8_v8 = vpop.permute.xlu0 %7   ;;  %v20_v9 = vpop.permute.xlu1 %19  }
  0x75   :  { %10 = vst.msk [vmem:[#allocation0] sm:$0x1] %vm9_vm1, %v8_v8  }
  0x78   :  { %v14_v10 = vpop.permute.xlu0 %13   ;;  %v26_v11 = vpop.permute.xlu1 %25  }
  0x79   :  { %16 = vst.msk [vmem:[#allocation0] sm:$0x1] %vm15_vm2, %v14_v10  }
  0x7a   :  { %22 = vst.msk [vmem:[#allocation0] sm:$0x1] %vm21_vm3, %v20_v9  }
  0x7b   :  { %28 = vst.msk [vmem:[#allocation0] sm:$0x1] %vm27_vm4, %v26_v11  }
  0x7c   :  { %v32_v12 = vpop.permute.xlu0 %31   ;;  %v38_v13 = vpop.permute.xlu1 %37  }
  0x7d   :  { %34 = vst.msk [vmem:[#allocation0] sm:$0x1] %vm33_vm5, %v32_v12  }
  0x7e   :  { %40 = vst.msk [vmem:[#allocation0] sm:$0x1] %vm39_vm6, %v38_v13  }
  0x80   :  { %v44_v14 = vpop.permute.xlu0 %43  }
  0x81   :  { %46 = vst.msk [vmem:[#allocation0] sm:$0x1] %vm45_vm7, %v44_v14  }
  0x88   :  { %v50_v15 = vld [vmem:[#allocation0] sm:$0x1] }
  0x89   :  { %52 = vst [vmem:[%s112_s1] sm:$0x1] %v50_v15 }

// kernel: input_downsampler_forward.2
= control target key start
LH: loop header
LB: loop body
LE: loop exit
PB: predicated region body
PF: predicated region fallthrough
CT: control target
= control target key end

     0   :  { %s3599_s15 = smov 0   ;;  %s4262_s0 = inlined_call_operand.vmem [shape: bf16[2,6,12,128], index: 0, kind: input, shape index: {}]   ;;  %s4263_s1 = inlined_call_operand.vmem [shape: bf16[15,128,128], index: 1, kind: input, shape index: {}]   ;;  %s4264_s2 = inlined_call_operand.vmem [shape: f32[1,128], index: 2, kind: input, shape index: {}]   ;;  %s4265_s3 = inlined_call_operand.vmem [shape: bf16[2,4,8,128], index: 3, kind: output, shape index: {0}]   ;;  %s4266_s4 = inlined_call_operand.vmem [shape: f32[2,2,128], index: 4, kind: output, shape index: {1}]  }
   0x1 LB: > { %s2474_s16 = sadd.s32 4294967295, %s3572_s15   ;;  %p2478_p0 = scmp.ge.s32.totalorder %s3572_s15, 1  ;;  %s3572_s15 = sphi %s3599_s15, %s15_s15  }
   0x2   : > { %p165_p1 = scmp.lt.s32.totalorder %s3572_s15, 3 }
   0x4   : > { %p166_p2 = pnand %p2478_p0, %p165_p1 }
   0x5   : > { %v3416_v0 = vld [vmem:[%s4263_s1 + $0x40] sm:$0xff] (!%p166_p2)   ;;  %p195_p3 = scmp.lt.s32.totalorder (!%p166_p2), %s2474_s16, 1  ;;  %v3418_v2 = vld [vmem:[%s4263_s1 + $0x48] sm:$0xff] (!%p166_p2)   ;;  %v3420_v4 = vld [vmem:[%s4263_s1 + $0x50] sm:$0xff] (!%p166_p2)   ;;  %vm223_vm0 = vcmask (!%p166_p2), 1043456   ;;  %vm2385_vm1 = vcmask (!%p166_p2), 1040384  }
   0x6   : > { %169 = sbr.rel (%p166_p2) target bundleno = 506 (0x1fa), region = 32  ;;  %v3417_v1 = vld [vmem:[%s4263_s1 + $0x1c0] sm:$0xff] (!%p166_p2)   ;;  %3051 = vmatprep.subr.bf16.mxu1 (!%p166_p2), %v3416_v0  ;;  %v3419_v3 = vld [vmem:[%s4263_s1 + $0x1c8] sm:$0xff] (!%p166_p2)   ;;  %v3421_v5 = vld [vmem:[%s4263_s1 + $0x1d0] sm:$0xff] (!%p166_p2)  }
   0x7   : > { %3191 = vmatprep.subr.bf16.mxu0 (!%p166_p2), %v3417_v1  ;;  %3052 = vmatpush3.bf16.msra.mxu1 (!%p166_p2), %v3416_v0  ;;  %v3422_v6 = vld [vmem:[%s4263_s1 + $0x58] sm:$0xff] (!%p166_p2)   ;;  %v3424_v8 = vld [vmem:[%s4263_s1 + $0x60] sm:$0xff] (!%p166_p2)   ;;  %v3426_v10 = vld [vmem:[%s4263_s1 + $0x68] sm:$0xff] (!%p166_p2)  }
   0x8   : > { %3192 = vmatpush3.bf16.msra.mxu0 (!%p166_p2), %v3417_v1  ;;  %3053 = vmatprep.subr.bf16.mxu1 (!%p166_p2), %v3418_v2  ;;  %v3423_v7 = vld [vmem:[%s4263_s1 + $0x1d8] sm:$0xff] (!%p166_p2)   ;;  %v3425_v9 = vld [vmem:[%s4263_s1 + $0x1e0] sm:$0xff] (!%p166_p2)   ;;  %v3427_v11 = vld [vmem:[%s4263_s1 + $0x1e8] sm:$0xff] (!%p166_p2)  }
   0x9   : > { %3193 = vmatprep.subr.bf16.mxu0 (!%p166_p2), %v3419_v3  ;;  %v3428_v25 = vld [vmem:[%s4263_s1 + $0x70] sm:$0xff] (!%p166_p2)   ;;  %v3430_v43 = vld [vmem:[%s4263_s1 + $0x78] sm:$0xff] (!%p166_p2)   ;;  %v3434_v55 = vld [vmem:[%s4263_s1] sm:$0xff] (!%p166_p2)  }
   0xa   : > { %v3429_v31 = vld [vmem:[%s4263_s1 + $0x1f0] sm:$0xff] (!%p166_p2)   ;;  %v3431_v49 = vld [vmem:[%s4263_s1 + $0x1f8] sm:$0xff] (!%p166_p2)   ;;  %v3440_v60 = vld [vmem:[%s4263_s1 + $0x200] sm:$0xff] (!%p166_p2)  }
   0xb   : > { %3054 = vmatpush3.bf16.msra.mxu1 (!%p166_p2), %v3418_v2 }
   0xc   : > { %3194 = vmatpush3.bf16.msra.mxu0 (!%p166_p2), %v3419_v3  ;;  %3055 = vmatprep.subr.bf16.mxu1 (!%p166_p2), %v3420_v4 }
   0xd   : > { %s4268_s16 = smov (!%p195_p3, %s2474_s16), 1  ;;  %3195 = vmatprep.subr.bf16.mxu0 %v3421_v5 }
   0xe   : > { %s3407_s7 = smul.u32 48, %s4268_s16  ;;  %s2889_s5 = sshll.u32 %s4268_s16, 4 }
   0xf   : > { %3056 = vmatpush3.bf16.msra.mxu1 %v3420_v4  ;;  %s204_s8 = scalar_lea.vmem %s4265_s3, %s2889_s5  ;;  %s2482_s9 = sshll.u32 %s4268_s16, 1 }
  0x10   : > { %3196 = vmatpush3.bf16.msra.mxu0 %v3421_v5  ;;  %3057 = vmatprep.subr.bf16.mxu1 %v3422_v6  ;;  %s3643_s14 = scalar_lea.vmem %s4262_s0, %s3407_s7  ;;  %s208_s12 = scalar_lea.vmem %s4266_s4, %s2482_s9 }
  0x11   : > { %3197 = vmatprep.subr.bf16.mxu0 %v3423_v7  ;;  %v3652_v12 = vld [vmem:[%s3643_s14] sm:$0xf]  ;;  %v3655_v13 = vld [vmem:[%s3643_s14 + $0x8] sm:$0xf]  ;;  %v3658_v14 = vld [vmem:[%s3643_s14 + $0x4] sm:$0x1] }
  0x12   : > { %v2488_v15 = vld [vmem:[%s3643_s14 + $0xc] sm:$0x1]  ;;  %v2491_v16 = vcombine.low %v3652_v12, %v3658_v14  ;;  %v3667_v18 = vld [vmem:[%s3643_s14 + $0x10] sm:$0xf]  ;;  %v2489_v19 = vld [vmem:[%s3643_s14 + $0x14] sm:$0x1]  ;;  %v2486_v3 = vcombine.low %v3655_v13, %v3655_v13 }
  0x13   : > { %3058 = vmatpush3.bf16.msra.mxu1 %v3422_v6  ;;  %v3664_v17 = vcombine.low %v3655_v13, %v2488_v15  ;;  %v3671_v22 = vcombine.low %v3667_v18, %v2489_v19  ;;  %v2527_v23 = vld [vmem:[%s3643_s14 + $0x8] sm:$0xe]  ;;  %v2528_v24 = vld [vmem:[%s3643_s14 + $0x10] sm:$0xe]  ;;  %v3685_v30 = vld [vmem:[%s3643_s14 + $0xc] sm:$0x3] }
  0x14   : > { %3198 = vmatpush3.bf16.msra.mxu0 %v3423_v7  ;;  %3059 = vmatprep.subr.bf16.mxu1 %v3424_v8  ;;  %v258_v20 = vshrl.u32 %v2491_v16, 16  ;;  %v260_v21 = vshll.u32 %v2491_v16, 16  ;;  %v3680_v28 = vcombine.low %v2527_v23, %v2488_v15  ;;  %v3682_v29 = vcombine.low %v2528_v24, %v2489_v19  ;;  %v3697_v37 = vld [vmem:[%s3643_s14 + $0x18] sm:$0xf]  ;;  %v2490_v39 = vld [vmem:[%s3643_s14 + $0x1c] sm:$0x1] }
  0x15   : > { %3199 = vmatprep.subr.bf16.mxu0 %v3425_v9  ;;  %v268_v26 = vshrl.u32 %v3664_v17, 16  ;;  %v271_v27 = vshll.u32 %v3664_v17, 16  ;;  %v281_v40 = vshrl.u32 %v3671_v22, 16  ;;  %v283_v41 = vshll.u32 %v3671_v22, 16  ;;  %v3703_v42 = vld [vmem:[%s3643_s14 + $0x18] sm:$0xe] }
  0x16   : > { %v262_v32 = vrot.slane %v260_v21, 1  ;;  %v1264_v35 = vrot.slane %v3680_v28, 1  ;;  %v1265_v36 = vrot.slane %v3682_v29, 5  ;;  %v3709_v45 = vld [vmem:[%s3643_s14 + $0x14] sm:$0x3]  ;;  %v3713_v47 = vcombine.low %v3697_v37, %v2490_v39 }
  0x17   : > { %3060 = vmatpush3.bf16.msra.mxu1 %v3424_v8  ;;  %v270_v33 = vrot.slane %v268_v26, 4  ;;  %v273_v34 = vrot.slane %v271_v27, 5  ;;  %v3716_v48 = vld [vmem:[%s3643_s14 + $0x24] sm:$0x1]  ;;  %v3722_v50 = vcombine.low %v2527_v23, %v3685_v30  ;;  %v285_v51 = vrot.slane %v283_v41, 1  ;;  %v3447_v8 = vld [vmem:[%s4263_s1 + $0x8] sm:$0xff]  }
  0x18   : > { %3200 = vmatpush3.bf16.msra.mxu0 %v3425_v9  ;;  %3061 = vmatprep.subr.bf16.mxu1 %v3426_v10  ;;  %v263_v38 = vor.u32 %v262_v32, %v258_v20  ;;  %v1273_v46 = vsel %vm223_vm0, %v1264_v35, %v1265_v36  ;;  %v3727_v52 = vcombine.low %v3703_v42, %v2490_v39  ;;  %v3730_v53 = vld [vmem:[%s3643_s14 + $0x20] sm:$0xe]  ;;  %v291_v56 = vshrl.u32 %v3713_v47, 16  ;;  %v3449_v20 = vld [vmem:[%s4263_s1 + $0x10] sm:$0xff]   ;;  %v3452_v32 = vld [vmem:[%s4263_s1 + $0x218] sm:$0xff]  }
  0x19   : > { %3201 = vmatprep.subr.bf16.mxu0 %v3427_v11  ;;  %v274_v44 = vor.u32 %v273_v34, %v270_v33  ;;  %3207 = vmatprep.mubr.bf16.mxu0 %v1273_v46  ;;  %v294_v57 = vshll.u32 %v3713_v47, 16  ;;  %v3740_v58 = vcombine.low %v3730_v53, %v3716_v48  ;;  %v3743_v59 = vcombine.low %v2528_v24, %v3709_v45  ;;  %v3793_v34 = vld [vmem:[%s3643_s14 + $0x1c] sm:$0x3]  ;;  %v3796_v35 = vld [vmem:[%s3643_s14 + $0x24] sm:$0x3]  ;;  %v3455_v46 = vld [vmem:[%s4263_s1 + $0x28] sm:$0xff]  }
  0x1a   : > { %v286_v61 = vor.u32 %v285_v51, %v281_v40  ;;  %v293_v62 = vrot.slane %v291_v56, 4  ;;  %v1266_v0 = vrot.slane %v3727_v52, 1  ;;  %v682_v4 = vshrl.u32 %v3722_v50, 16  ;;  %v3453_v36 = vld [vmem:[%s4263_s1 + $0x20] sm:$0xff]   ;;  %v3457_v51 = vld [vmem:[%s4263_s1 + $0x30] sm:$0xff]  }
  0x1b   : > { %3062 = vmatpush3.bf16.msra.mxu1 %v3426_v10  ;;  %v300_v54 = vsel %vm223_vm0, %v263_v38, %v274_v44  ;;  %v296_v63 = vrot.slane %v294_v57, 5  ;;  %v1270_v1 = vrot.slane %v3740_v58, 5  ;;  %v685_v5 = vshll.u32 %v3722_v50, 16  ;;  %v3448_v10 = vld [vmem:[%s4263_s1 + $0x208] sm:$0xff]   ;;  %v3454_v38 = vld [vmem:[%s4263_s1 + $0x220] sm:$0xff]  }
  0x1c   : > { %3202 = vmatpush3.bf16.msra.mxu0 %v3427_v11  ;;  %3063 = vmatprep.subr.bf16.mxu1 %v3428_v25  ;;  %v693_v9 = vshrl.u32 %v3743_v59, 16  ;;  %v696_v11 = vshll.u32 %v3743_v59, 16  ;;  %v226_v15 = vsel %vm223_vm0, %v3652_v12, %v2486_v3  ;;  %v1398_v16 = vrot.slane %v682_v4, 1  ;;  %v3450_v12 = vld [vmem:[%s4263_s1 + $0x210] sm:$0xff]  }
  0x1d   : > { %3203 = vmatprep.subr.bf16.mxu0 %v3429_v31  ;;  %3067 = vmatprep.mubr.bf16.mxu1 %v300_v54  ;;  %v297_v2 = vor.u32 %v296_v63, %v293_v62  ;;  %v1277_v7 = vsel %vm223_vm0, %v1266_v0, %v1270_v1  ;;  %v1399_v19 = vrot.slane %v685_v5, 2  ;;  %v2564_v39 = vcombine.low %v3703_v42, %v3793_v34  ;;  %v3456_v42 = vld [vmem:[%s4263_s1 + $0x228] sm:$0xff]  }
  0x1e   : > { %v1401_v21 = vrot.slane %v693_v9, 5  ;;  %v1402_v24 = vrot.slane %v696_v11, 6  ;;  %v532_v44 = vrot.slane %v3682_v29, 1  ;;  %v695_v59 = vrot.slane %v693_v9, 1  ;;  %v3837_v9 = vld [vmem:[%s3643_s14] sm:$0xe] }
  0x1f   : > { %3064 = vmatpush3.bf16.msra.mxu1 %v3428_v25  ;;  %v3761_v6 = vsel %vm223_vm0, %v286_v61, %v297_v2  ;;  %v1400_v23 = vor.u32 %v1399_v19, %v1398_v16  ;;  %v707_v54 = vshll.u32 %v2564_v39, 16  ;;  %v3458_v61 = vld [vmem:[%s4263_s1 + $0x230] sm:$0xff]   ;;  %v3459_v2 = vld [vmem:[%s4263_s1 + $0x38] sm:$0xff]   ;;  %v2589_v16 = vld [vmem:[%s3643_s14 + $0x8] sm:$0xc] }
  0x20   : > { %3204 = vmatpush3.bf16.msra.mxu0 %v3429_v31  ;;  %3065 = vmatprep.subr.bf16.mxu1 %v3430_v43  ;;  %v1403_v25 = vor.u32 %v1402_v24, %v1401_v21  ;;  %v3451_v31 = vld [vmem:[%s4263_s1 + $0x18] sm:$0xff]   ;;  %v2590_v19 = vld [vmem:[%s3643_s14 + $0x10] sm:$0xc]  ;;  %v2487_v21 = vcombine.low %v3697_v37, %v3697_v37 }
  0x21   : > { %3205 = vmatprep.subr.bf16.mxu0 %v3431_v49  ;;  %v709_v0 = vrot.slane %v707_v54, 6  ;;  %v1405_v3 = vrot.slane %v707_v54, 2 }
  0x22   : > { %v1420_v33 = vsel %vm223_vm0, %v1400_v23, %v1403_v25  ;;  %v2594_v23 = vcombine.low %v2590_v19, %v3709_v45  ;;  %v528_v45 = vrot.slane %v3680_v28, 5  ;;  %v3466_v28 = vld [vmem:[%s4263_s1 + $0x248] sm:$0xff]   ;;  %v3478_v19 = vld [vmem:[%s4263_s1 + $0x278] sm:$0xff]  }
  0x23   : > { %3066 = vmatpush3.bf16.msra.mxu1 %v3430_v43  ;;  %v3808_v43 = vcombine.low %v3730_v53, %v3796_v35  ;;  %v704_v53 = vshrl.u32 %v2564_v39, 16  ;;  %v2621_v39 = vcombine.low %v3667_v18, %v3667_v18 }
  0x24   : > { %3206 = vmatpush3.bf16.msra.mxu0 %v3431_v49  ;;  %3071 = vmatprep.subr.bf16.mxu1 %v3434_v55  ;;  %v536_v49 = vrot.slane %v3727_v52, 5 }
  0x25   : > { %3211 = vmatprep.subr.bf16.mxu0 %v3440_v60  ;;  %v1414_v52 = vshll.u32 %v3808_v43, 16  ;;  %v706_v62 = vrot.slane %v704_v53, 5  ;;  %v1404_v1 = vrot.slane %v704_v53, 1 }
  0x26   : > { %3068 = vmatmul.mubr.bf16.vlgmr.msra.gmra.mrb[0].mxu1 %v3761_v6  ;;  %v3822_v29 = vsel %vm223_vm0, %v532_v44, %v536_v49  ;;  %v3881_v49 = vsel %vm223_vm0, %v3655_v13, %v2621_v39  ;;  %v852_v13 = vrot.slane %v2594_v23, 2  ;;  %v3490_v39 = vld [vmem:[%s4263_s1 + $0x290] sm:$0xff]  }
  0x27   : > { %3072 = vmatpush3.bf16.msra.mxu1 %v3434_v55  ;;  %3208 = vmatmul.mubr.bf16.vlgmr.msra.gmra.mrb[0].mxu0 %v1277_v7  ;;  %v1411_v55 = vshrl.u32 %v3808_v43, 16  ;;  %v1406_v24 = vor.u32 %v1405_v3, %v1404_v1  ;;  %v3474_v1 = vld [vmem:[%s4263_s1 + $0x268] sm:$0xff]   ;;  %v3475_v3 = vld [vmem:[%s4263_s1 + $0xb0] sm:$0xff]  }
  0x28   : > { %3212 = vmatpush3.bf16.msra.mxu0 %v3440_v60  ;;  %3073 = vmatprep.subr.bf16.mxu1 %v3447_v8  ;;  %v698_v60 = vrot.slane %v696_v11, 2  ;;  %v3460_v11 = vld [vmem:[%s4263_s1 + $0x238] sm:$0xff]   ;;  %v3495_v43 = vld [vmem:[%s4263_s1 + $0xe8] sm:$0xff]  }
  0x29   : > { %3213 = vmatprep.subr.bf16.mxu0 %v3448_v10  ;;  %3087 = vmatprep.mubr.bf16.mxu1 %v226_v15  ;;  %v1413_v7 = vrot.slane %v1411_v55, 5  ;;  %v2530_v15 = vcombine.low %v3837_v9, %v3658_v14  ;;  %v3462_v14 = vld [vmem:[%s4263_s1 + $0x80] sm:$0xff]  }
  0x2a   : > { %3227 = vmatprep.mubr.bf16.mxu0 %v1420_v33  ;;  %v699_v63 = vor.u32 %v698_v60, %v695_v59  ;;  %v3469_v59 = vld [vmem:[%s4263_s1 + $0x98] sm:$0xff]  }
  0x2b   : > { %3074 = vmatpush3.bf16.msra.mxu1 %v3447_v8  ;;  %v1416_v8 = vrot.slane %v1414_v52, 6  ;;  %v524_v37 = vrot.slane %v2530_v15, 1  ;;  %v3470_v60 = vld [vmem:[%s4263_s1 + $0x258] sm:$0xff]  }
  0x2c   : > { %3214 = vmatpush3.bf16.msra.mxu0 %v3448_v10  ;;  %3075 = vmatprep.subr.bf16.mxu1 %v3449_v20  ;;  %v710_v10 = vor.u32 %v709_v0, %v706_v62  ;;  %v3472_v62 = vld [vmem:[%s4263_s1 + $0x260] sm:$0xff]   ;;  %v3473_v0 = vld [vmem:[%s4263_s1 + $0xa8] sm:$0xff]  }
  0x2d   : > { %3215 = vmatprep.subr.bf16.mxu0 %v3450_v12  ;;  %v1417_v25 = vor.u32 %v1416_v8, %v1413_v7  ;;  %v539_v44 = vsel %vm223_vm0, %v524_v37, %v528_v45  ;;  %v3476_v7 = vld [vmem:[%s4263_s1 + $0x270] sm:$0xff]   ;;  %v2726_v8 = vld [vmem:[%s3643_s14 + $0x20] sm:$0xc]  ;;  %v3487_v37 = vld [vmem:[%s4263_s1 + $0xc8] sm:$0xff]  }
  0x2e   : > { %v3928_v15 = vcombine.low %v2726_v8, %v3796_v35  ;;  %v3488_v45 = vld [vmem:[%s4263_s1 + $0x288] sm:$0xff]   ;;  %v4026_v8 = vld [vmem:[%s3643_s14 + $0x20] sm:$0xf] }
  0x2f   : > { %3076 = vmatpush3.bf16.msra.mxu1 %v3449_v20  ;;  %v3847_v20 = vsel %vm223_vm0, %v699_v63, %v710_v10  ;;  %v3907_v63 = vld [vmem:[%s3643_s14 + $0x4] sm:$0x3] }
  0x30   : > { %3216 = vmatpush3.bf16.msra.mxu0 %v3450_v12  ;;  %3077 = vmatprep.subr.bf16.mxu1 %v3451_v31  ;;  %v3852_v12 = vcombine.low %v2589_v16, %v3685_v30  ;;  %v3465_v30 = vld [vmem:[%s4263_s1 + $0x88] sm:$0xff]   ;;  %v684_v16 = vrot.slane %v682_v4, 5  ;;  %v1551_v4 = vrot.slane %v3928_v15, 6 }
  0x31   : > { %3217 = vmatprep.subr.bf16.mxu0 %v3452_v32 }
  0x32   : > { %v1545_v33 = vrot.slane %v3852_v12, 2 }
  0x33   : > { %3078 = vmatpush3.bf16.msra.mxu1 %v3451_v31  ;;  %v3463_v31 = vld [vmem:[%s4263_s1 + $0x240] sm:$0xff]  }
  0x34   : > { %3218 = vmatpush3.bf16.msra.mxu0 %v3452_v32  ;;  %3079 = vmatprep.subr.bf16.mxu1 %v3453_v36  ;;  %v3867_v32 = vsel %vm223_vm0, %v3667_v18, %v2487_v21  ;;  %v3467_v18 = vld [vmem:[%s4263_s1 + $0x90] sm:$0xff]   ;;  %v687_v21 = vrot.slane %v685_v5, 6 }
  0x35   : > { %3219 = vmatprep.subr.bf16.mxu0 %v3454_v38 }
  0x36   : > { %v688_v5 = vor.u32 %v687_v21, %v684_v16  ;;  %v3506_v16 = vld [vmem:[%s4263_s1 + $0x2c8] sm:$0xff]   ;;  %v3508_v21 = vld [vmem:[%s4263_s1 + $0x2d0] sm:$0xff]  }
  0x37   : > { %3080 = vmatpush3.bf16.msra.mxu1 %v3453_v36  ;;  %v1546_v36 = vrot.slane %v2594_v23, 6 }
  0x38   : > { %3220 = vmatpush3.bf16.msra.mxu0 %v3454_v38  ;;  %3081 = vmatprep.subr.bf16.mxu1 %v3455_v46  ;;  %v1424_v38 = vsel %vm223_vm0, %v1406_v24, %v1417_v25  ;;  %v3481_v24 = vld [vmem:[%s4263_s1 + $0xc0] sm:$0xff]  }
  0x39   : > { %3221 = vmatprep.subr.bf16.mxu0 %v3456_v42  ;;  %v3484_v25 = vld [vmem:[%s4263_s1 + $0x280] sm:$0xff]  }
  0x3b   : > { %3082 = vmatpush3.bf16.msra.mxu1 %v3455_v46  ;;  %v2591_v46 = vld [vmem:[%s3643_s14 + $0x18] sm:$0xc] }
  0x3c   : > { %3222 = vmatpush3.bf16.msra.mxu0 %v3456_v42  ;;  %3083 = vmatprep.subr.bf16.mxu1 %v3457_v51  ;;  %v1554_v42 = vsel %vm223_vm0, %v1545_v33, %v1546_v36  ;;  %v2595_v53 = vcombine.low %v2591_v46, %v3793_v34  ;;  %v3471_v34 = vld [vmem:[%s4263_s1 + $0xa0] sm:$0xff]   ;;  %v3491_v46 = vld [vmem:[%s4263_s1 + $0xd8] sm:$0xff]  }
  0x3d   : > { %3223 = vmatprep.subr.bf16.mxu0 %v3458_v61 }
  0x3e   : > { %v856_v54 = vrot.slane %v2595_v53, 6  ;;  %v1547_v35 = vrot.slane %v2595_v53, 2  ;;  %v3988_v53 = vrot.slane %v1414_v52, 2  ;;  %v3496_v52 = vld [vmem:[%s4263_s1 + $0x2a8] sm:$0xff]  }
  0x3f   : > { %3084 = vmatpush3.bf16.msra.mxu1 %v3457_v51  ;;  %v3468_v51 = vld [vmem:[%s4263_s1 + $0x250] sm:$0xff]  }
  0x40   : > { %3224 = vmatpush3.bf16.msra.mxu0 %v3458_v61  ;;  %3085 = vmatprep.subr.bf16.mxu1 %v3459_v2  ;;  %v3898_v61 = vsel %vm223_vm0, %v852_v13, %v856_v54  ;;  %v3493_v13 = vld [vmem:[%s4263_s1 + $0xe0] sm:$0xff]  }
  0x41   : > { %3225 = vmatprep.subr.bf16.mxu0 %v3460_v11 }
  0x43   : > { %3086 = vmatpush3.bf16.msra.mxu1 %v3459_v2  ;;  %v2561_v2 = vcombine.low %v3837_v9, %v3907_v63  ;;  %v3477_v9 = vld [vmem:[%s4263_s1 + $0xb8] sm:$0xff]  }
  0x44   : > { %3226 = vmatpush3.bf16.msra.mxu0 %v3460_v11  ;;  %3091 = vmatprep.subr.bf16.mxu1 %v3462_v14 }
  0x45   : > { %3231 = vmatprep.subr.bf16.mxu0 %v3463_v31  ;;  %v671_v10 = vshrl.u32 %v2561_v2, 16  ;;  %v674_v11 = vshll.u32 %v2561_v2, 16 }
  0x46   : > { %3088 = vmatmul.mubr.bf16.vlgmr.msra.gmra.mrb[0].mxu1 %v3867_v32 }
  0x47   : > { %3092 = vmatpush3.bf16.msra.mxu1 %v3462_v14  ;;  %3228 = vmatmul.mubr.bf16.vlgmr.msra.gmra.mrb[0].mxu0 %v1424_v38  ;;  %v673_v23 = vrot.slane %v671_v10, 1  ;;  %v676_v14 = vrot.slane %v674_v11, 2  ;;  %v3489_v38 = vld [vmem:[%s4263_s1 + $0xd0] sm:$0xff]   ;;  %v848_v11 = vrot.slane %v3852_v12, 6 }
  0x48   : > { %3232 = vmatpush3.bf16.msra.mxu0 %v3463_v31  ;;  %3093 = vmatprep.subr.bf16.mxu1 %v3465_v30  ;;  %v2647_v31 = vld [vmem:[%s3643_s14 + $0x20] sm:$0xf]  ;;  %v3507_v12 = vld [vmem:[%s4263_s1 + $0x110] sm:$0xff]  }
  0x49   : > { %3233 = vmatprep.subr.bf16.mxu0 %v3466_v28  ;;  %3107 = vmatprep.mubr.bf16.mxu1 %v539_v44  ;;  %v677_v50 = vor.u32 %v676_v14, %v673_v23  ;;  %v3953_v33 = vcombine.low %v2647_v31, %v3716_v48  ;;  %v3509_v23 = vld [vmem:[%s4263_s1 + $0x118] sm:$0xff]  }
  0x4a   : > { %3247 = vmatprep.mubr.bf16.mxu0 %v1554_v42  ;;  %v3510_v14 = vld [vmem:[%s4263_s1 + $0x2d8] sm:$0xff]  }
  0x4b   : > { %3094 = vmatpush3.bf16.msra.mxu1 %v3465_v30  ;;  %v1558_v30 = vsel %vm223_vm0, %v1547_v35, %v1551_v4  ;;  %v713_v36 = vsel %vm223_vm0, %v677_v50, %v688_v5  ;;  %v1130_v48 = vshrl.u32 %v3953_v33, 16  ;;  %v2778_v35 = vld [vmem:[%s3643_s14 + $0x28] sm:$0xf]  ;;  %v4060_v4 = vld [vmem:[%s3643_s14 + $0x2c] sm:$0x1]  ;;  %v3515_v5 = vld [vmem:[%s4263_s1 + $0x130] sm:$0xff]  }
  0x4c   : > { %3234 = vmatpush3.bf16.msra.mxu0 %v3466_v28  ;;  %3095 = vmatprep.subr.bf16.mxu1 %v3467_v18  ;;  %v1133_v28 = vshll.u32 %v3953_v33, 16  ;;  %v2780_v31 = vcombine.low %v2778_v35, %v4060_v4  ;;  %v3514_v50 = vld [vmem:[%s4263_s1 + $0x2e8] sm:$0xff]   ;;  %v3545_v35 = vld [vmem:[%s4263_s1 + $0x350] sm:$0xff]  }
  0x4d   : > { %3235 = vmatprep.subr.bf16.mxu0 %v3468_v51  ;;  %v3968_v44 = vrot.slane %v1130_v48, 4  ;;  %v3524_v33 = vld [vmem:[%s4263_s1 + $0x308] sm:$0xff]  }
  0x4e   : > { %v3975_v42 = vrot.slane %v1133_v28, 5 }
  0x4f   : > { %3096 = vmatpush3.bf16.msra.mxu1 %v3467_v18  ;;  %v3982_v18 = vrot.slane %v1411_v55, 1  ;;  %v3494_v55 = vld [vmem:[%s4263_s1 + $0x2a0] sm:$0xff]  }
  0x50   : > { %3236 = vmatpush3.bf16.msra.mxu0 %v3468_v51  ;;  %3097 = vmatprep.subr.bf16.mxu1 %v3469_v59  ;;  %v1136_v51 = vor.u32 %v3975_v42, %v3968_v44  ;;  %v3558_v44 = vld [vmem:[%s4263_s1 + $0x390] sm:$0xff]   ;;  %v3559_v42 = vld [vmem:[%s4263_s1 + $0x398] sm:$0xff]  }
  0x51   : > { %3237 = vmatprep.subr.bf16.mxu0 %v3470_v60  ;;  %v2075_v54 = vor.u32 %v3988_v53, %v3982_v18  ;;  %v3560_v18 = vld [vmem:[%s4263_s1 + $0x3a0] sm:$0xff]   ;;  %v2857_v53 = vld [vmem:[%s3643_s14 + $0x28] sm:$0xc] }
  0x53   : > { %3098 = vmatpush3.bf16.msra.mxu1 %v3469_v59  ;;  %v3497_v59 = vld [vmem:[%s4263_s1 + $0xf0] sm:$0xff]  }
  0x54   : > { %3238 = vmatpush3.bf16.msra.mxu0 %v3470_v60  ;;  %3099 = vmatprep.subr.bf16.mxu1 %v3471_v34  ;;  %v3498_v60 = vld [vmem:[%s4263_s1 + $0x2b0] sm:$0xff]  }
  0x55   : > { %3239 = vmatprep.subr.bf16.mxu0 %v3472_v62 }
  0x57   : > { %3100 = vmatpush3.bf16.msra.mxu1 %v3471_v34  ;;  %v837_v34 = vld [vmem:[%s3643_s14] sm:$0xc] }
  0x58   : > { %3240 = vmatpush3.bf16.msra.mxu0 %v3472_v62  ;;  %3101 = vmatprep.subr.bf16.mxu1 %v3473_v0  ;;  %v3499_v62 = vld [vmem:[%s4263_s1 + $0xf8] sm:$0xff]   ;;  %v2592_v2 = vcombine.low %v837_v34, %v3907_v63 }
  0x59   : > { %3241 = vmatprep.subr.bf16.mxu0 %v3474_v1  ;;  %v3527_v34 = vld [vmem:[%s4263_s1 + $0x158] sm:$0xff]  }
  0x5a   : > { %v844_v10 = vrot.slane %v2592_v2, 2  ;;  %v3533_v2 = vld [vmem:[%s4263_s1 + $0x170] sm:$0xff]  }
  0x5b   : > { %3102 = vmatpush3.bf16.msra.mxu1 %v3473_v0  ;;  %v3500_v0 = vld [vmem:[%s4263_s1 + $0x2b8] sm:$0xff]  }
  0x5c   : > { %3242 = vmatpush3.bf16.msra.mxu0 %v3474_v1  ;;  %3103 = vmatprep.subr.bf16.mxu1 %v3475_v3  ;;  %v3501_v1 = vld [vmem:[%s4263_s1 + $0x100] sm:$0xff]  }
  0x5d   : > { %3243 = vmatprep.subr.bf16.mxu0 %v3476_v7 }
  0x5f   : > { %3104 = vmatpush3.bf16.msra.mxu1 %v3475_v3  ;;  %v3502_v3 = vld [vmem:[%s4263_s1 + $0x2c0] sm:$0xff]  }
  0x60   : > { %3244 = vmatpush3.bf16.msra.mxu0 %v3476_v7  ;;  %3105 = vmatprep.subr.bf16.mxu1 %v3477_v9  ;;  %v3504_v7 = vld [vmem:[%s3643_s14 + $0x28] ss:$0 sps:$4 sm:$0xff]  }
  0x61   : > { %3245 = vmatprep.subr.bf16.mxu0 %v3478_v19  ;;  %v1685_v63 = vsel %vm223_vm0, %v4026_v8, %v3504_v7  ;;  %v2805_v7 = vld [vmem:[%s3643_s14 + $0x28] sm:$0xe] }
  0x63   : > { %3106 = vmatpush3.bf16.msra.mxu1 %v3477_v9  ;;  %v3505_v9 = vld [vmem:[%s4263_s1 + $0x108] sm:$0xff]  }
  0x64   : > { %3246 = vmatpush3.bf16.msra.mxu0 %v3478_v19  ;;  %3111 = vmatprep.subr.bf16.mxu1 %v3481_v24  ;;  %v859_v19 = vsel %vm223_vm0, %v844_v10, %v848_v11  ;;  %v3535_v10 = vld [vmem:[%s4263_s1 + $0x178] sm:$0xff]   ;;  %v2806_v11 = vcombine.low %v2805_v7, %v4060_v4 }
  0x65   : > { %3251 = vmatprep.subr.bf16.mxu0 %v3484_v25  ;;  %v3546_v4 = vld [vmem:[%s4263_s1 + $0x198] sm:$0xff]  }
  0x66   : > { %3108 = vmatmul.mubr.bf16.vlgmr.msra.gmra.mrb[0].mxu1 %v3822_v29 }
  0x67   : > { %3112 = vmatpush3.bf16.msra.mxu1 %v3481_v24  ;;  %3248 = vmatmul.mubr.bf16.vlgmr.msra.gmra.mrb[0].mxu0 %v1558_v30  ;;  %v3511_v24 = vld [vmem:[%s4263_s1 + $0x120] sm:$0xff]   ;;  %v1815_v30 = vshrl.u32 %v2780_v31, 16 }
  0x68   : > { %3252 = vmatpush3.bf16.msra.mxu0 %v3484_v25  ;;  %3113 = vmatprep.subr.bf16.mxu1 %v3487_v37  ;;  %v3513_v25 = vld [vmem:[%s4263_s1 + $0x128] sm:$0xff]  }
  0x69   : > { %3253 = vmatprep.subr.bf16.mxu0 %v3488_v45  ;;  %3127 = vmatprep.mubr.bf16.mxu1 %v713_v36  ;;  %v3517_v36 = vld [vmem:[%s4263_s1 + $0x138] sm:$0xff]  }
  0x6a   : > { %3267 = vmatprep.mubr.bf16.mxu0 %v3867_v32  ;;  %v3492_v32 = vld [vmem:[%s4263_s1 + $0x298] sm:$0xff]  }
  0x6b   : > { %3114 = vmatpush3.bf16.msra.mxu1 %v3487_v37  ;;  %v1818_v37 = vshll.u32 %v2780_v31, 16  ;;  %v3548_v31 = vld [vmem:[%s4263_s1 + $0x1a0] sm:$0xff]  }
  0x6c   : > { %3254 = vmatpush3.bf16.msra.mxu0 %v3488_v45  ;;  %3115 = vmatprep.subr.bf16.mxu1 %v3489_v38  ;;  %v3516_v45 = vld [vmem:[%s4263_s1 + $0x2f0] sm:$0xff]  }
  0x6d   : > { %3255 = vmatprep.subr.bf16.mxu0 %v3490_v39 }
  0x6f   : > { %3116 = vmatpush3.bf16.msra.mxu1 %v3489_v38  ;;  %v1807_v38 = vrot.slane %v1133_v28, 1  ;;  %v3521_v28 = vld [vmem:[%s4263_s1 + $0x300] sm:$0xff]  }
  0x70   : > { %3256 = vmatpush3.bf16.msra.mxu0 %v3490_v39  ;;  %3117 = vmatprep.subr.bf16.mxu1 %v3491_v46  ;;  %v1817_v39 = vrot.slane %v1815_v30, 4  ;;  %v3550_v30 = vld [vmem:[%s4263_s1 + $0x1a8] sm:$0xff]  }
  0x71   : > { %3257 = vmatprep.subr.bf16.mxu0 %v3492_v32 }
  0x73   : > { %3118 = vmatpush3.bf16.msra.mxu1 %v3491_v46  ;;  %v1820_v46 = vrot.slane %v1818_v37, 5  ;;  %v3551_v37 = vld [vmem:[%s4263_s1 + $0x368] sm:$0xff]  }
  0x74   : > { %3258 = vmatpush3.bf16.msra.mxu0 %v3492_v32  ;;  %3119 = vmatprep.subr.bf16.mxu1 %v3493_v13  ;;  %v3518_v32 = vld [vmem:[%s4263_s1 + $0x2f8] sm:$0xff]  }
  0x75   : > { %3259 = vmatprep.subr.bf16.mxu0 %v3494_v55 }
  0x77   : > { %3120 = vmatpush3.bf16.msra.mxu1 %v3493_v13  ;;  %v3520_v13 = vld [vmem:[%s4263_s1 + $0x140] sm:$0xff]  }
  0x78   : > { %3260 = vmatpush3.bf16.msra.mxu0 %v3494_v55  ;;  %3121 = vmatprep.subr.bf16.mxu1 %v3495_v43  ;;  %v1808_v55 = vor.u32 %v1807_v38, %v1130_v48  ;;  %v3525_v48 = vld [vmem:[%s4263_s1 + $0x150] sm:$0xff]  }
  0x79   : > { %3261 = vmatprep.subr.bf16.mxu0 %v3496_v52 }
  0x7b   : > { %3122 = vmatpush3.bf16.msra.mxu1 %v3495_v43  ;;  %v1821_v43 = vor.u32 %v1820_v46, %v1817_v39  ;;  %v3553_v39 = vld [vmem:[%s4263_s1 + $0x370] sm:$0xff]   ;;  %v1122_v46 = vrot.slane %v294_v57, 1 }
  0x7c   : > { %3262 = vmatpush3.bf16.msra.mxu0 %v3496_v52  ;;  %3123 = vmatprep.subr.bf16.mxu1 %v3497_v59 }
  0x7d   : > { %3263 = vmatprep.subr.bf16.mxu0 %v3498_v60  ;;  %v1824_v52 = vsel %vm223_vm0, %v1808_v55, %v1821_v43  ;;  %v3555_v43 = vld [vmem:[%s4263_s1 + $0x378] sm:$0xff]  }
  0x7f   : > { %3124 = vmatpush3.bf16.msra.mxu1 %v3497_v59  ;;  %v3523_v59 = vld [vmem:[%s4263_s1 + $0x148] sm:$0xff]  }
  0x80   : > { %3264 = vmatpush3.bf16.msra.mxu0 %v3498_v60  ;;  %3125 = vmatprep.subr.bf16.mxu1 %v3499_v62  ;;  %v3526_v60 = vld [vmem:[%s4263_s1 + $0x310] sm:$0xff]  }
  0x81   : > { %3265 = vmatprep.subr.bf16.mxu0 %v3500_v0 }
  0x83   : > { %3126 = vmatpush3.bf16.msra.mxu1 %v3499_v62  ;;  %v3528_v62 = vld [vmem:[%s4263_s1 + $0x318] sm:$0xff]  }
  0x84   : > { %3266 = vmatpush3.bf16.msra.mxu0 %v3500_v0  ;;  %3131 = vmatprep.subr.bf16.mxu1 %v3501_v1  ;;  %v3531_v0 = vld [vmem:[%s4263_s1 + $0x168] sm:$0xff]  }
  0x85   : > { %3271 = vmatprep.subr.bf16.mxu0 %v3502_v3 }
  0x86   : > { %3128 = vmatmul.mubr.bf16.vlgmr.msra.gmra.mrb[0].mxu1 %v3847_v20 }
  0x87   : > { %3132 = vmatpush3.bf16.msra.mxu1 %v3501_v1  ;;  %3268 = vmatmul.mubr.bf16.vlgmr.msra.gmra.mrb[0].mxu0 %v1685_v63  ;;  %v3532_v1 = vld [vmem:[%s4263_s1 + $0x328] sm:$0xff]   ;;  %v3536_v63 = vld [vmem:[%s4263_s1 + $0x338] sm:$0xff]  }
  0x88   : > { %3272 = vmatpush3.bf16.msra.mxu0 %v3502_v3  ;;  %3133 = vmatprep.subr.bf16.mxu1 %v3505_v9  ;;  %v3534_v3 = vld [vmem:[%s4263_s1 + $0x330] sm:$0xff]  }
  0x89   : > { %3273 = vmatprep.subr.bf16.mxu0 %v3506_v16  ;;  %3147 = vmatprep.mubr.bf16.mxu1 %v859_v19  ;;  %v1120_v19 = vrot.slane %v283_v41, 5  ;;  %v3565_v41 = vld [vmem:[%s3643_s14 + $0x18] sm:$0xf] }
  0x8a   : > { %3287 = vmatprep.mubr.bf16.mxu0 %v3761_v6  ;;  %v3512_v6 = vld [vmem:[%s4263_s1 + $0x2e0] sm:$0xff]  }
  0x8b   : > { %3134 = vmatpush3.bf16.msra.mxu1 %v3505_v9  ;;  %v1117_v9 = vrot.slane %v271_v27, 1  ;;  %v3539_v27 = vld [vmem:[%s4263_s1 + $0x340] sm:$0xff]  }
  0x8c   : > { %3274 = vmatpush3.bf16.msra.mxu0 %v3506_v16  ;;  %3135 = vmatprep.subr.bf16.mxu1 %v3507_v12  ;;  %v1119_v16 = vrot.slane %v281_v40, 4 }
  0x8d   : > { %3275 = vmatprep.subr.bf16.mxu0 %v3508_v21  ;;  %v1118_v22 = vor.u32 %v1117_v9, %v268_v26  ;;  %v3544_v26 = vld [vmem:[%s4263_s1 + $0x190] sm:$0xff]  }
  0x8e   : > { %v1121_v40 = vor.u32 %v1120_v19, %v1119_v16 }
  0x8f   : > { %3136 = vmatpush3.bf16.msra.mxu1 %v3507_v12  ;;  %v2622_v12 = vcombine.low %v4026_v8, %v4026_v8 }
  0x90   : > { %3276 = vmatpush3.bf16.msra.mxu0 %v3508_v21  ;;  %3137 = vmatprep.subr.bf16.mxu1 %v3509_v23  ;;  %v3538_v21 = vld [vmem:[%s4263_s1 + $0x180] sm:$0xff]   ;;  %v1139_v17 = vsel %vm223_vm0, %v1118_v22, %v1121_v40 }
  0x91   : > { %3277 = vmatprep.subr.bf16.mxu0 %v3510_v14  ;;  %v995_v8 = vsel %vm223_vm0, %v3565_v41, %v2622_v12 }
  0x93   : > { %3138 = vmatpush3.bf16.msra.mxu1 %v3509_v23  ;;  %v1945_v23 = vrot.slane %v3740_v58, 1  ;;  %v3542_v58 = vld [vmem:[%s4263_s1 + $0x188] sm:$0xff]  }
  0x94   : > { %3278 = vmatpush3.bf16.msra.mxu0 %v3510_v14  ;;  %3139 = vmatprep.subr.bf16.mxu1 %v3511_v24  ;;  %v1949_v14 = vrot.slane %v2806_v11, 5 }
  0x95   : > { %3279 = vmatprep.subr.bf16.mxu0 %v3512_v6 }
  0x97   : > { %3140 = vmatpush3.bf16.msra.mxu1 %v3511_v24  ;;  %v1952_v24 = vsel %vm223_vm0, %v1945_v23, %v1949_v14 }
  0x98   : > { %3280 = vmatpush3.bf16.msra.mxu0 %v3512_v6  ;;  %3141 = vmatprep.subr.bf16.mxu1 %v3513_v25  ;;  %v3543_v6 = vld [vmem:[%s4263_s1 + $0x348] sm:$0xff]  }
  0x99   : > { %3281 = vmatprep.subr.bf16.mxu0 %v3514_v50 }
  0x9b   : > { %3142 = vmatpush3.bf16.msra.mxu1 %v3513_v25  ;;  %v3547_v25 = vld [vmem:[%s4263_s1 + $0x358] sm:$0xff]  }
  0x9c   : > { %3282 = vmatpush3.bf16.msra.mxu0 %v3514_v50  ;;  %3143 = vmatprep.subr.bf16.mxu1 %v3515_v5  ;;  %v3549_v50 = vld [vmem:[%s4263_s1 + $0x360] sm:$0xff]  }
  0x9d   : > { %3283 = vmatprep.subr.bf16.mxu0 %v3516_v45 }
  0x9f   : > { %3144 = vmatpush3.bf16.msra.mxu1 %v3515_v5 }
  0xa0   : > { %3284 = vmatpush3.bf16.msra.mxu0 %v3516_v45  ;;  %3145 = vmatprep.subr.bf16.mxu1 %v3517_v36  ;;  %v3552_v45 = vld [vmem:[%s4263_s1 + $0x1b0] sm:$0xff]  }
  0xa1   : > { %3285 = vmatprep.subr.bf16.mxu0 %v3518_v32 }
  0xa3   : > { %3146 = vmatpush3.bf16.msra.mxu1 %v3517_v36 }
  0xa4   : > { %3286 = vmatpush3.bf16.msra.mxu0 %v3518_v32  ;;  %3151 = vmatprep.subr.bf16.mxu1 %v3520_v13  ;;  %v3554_v32 = vld [vmem:[%s4263_s1 + $0x1b8] sm:$0xff]  }
  0xa5   : > { %3291 = vmatprep.subr.bf16.mxu0 %v3521_v28 }
  0xa6   : > { %3148 = vmatmul.mubr.bf16.vlgmr.msra.gmra.mrb[0].mxu1 %v3898_v61 }
  0xa7   : > { %3152 = vmatpush3.bf16.msra.mxu1 %v3520_v13  ;;  %3288 = vmatmul.mubr.bf16.vlgmr.msra.gmra.mrb[0].mxu0 %v1824_v52  ;;  %v3556_v52 = vld [vmem:[%s4263_s1 + $0x380] sm:$0xff]  }
  0xa8   : > { %3292 = vmatpush3.bf16.msra.mxu0 %v3521_v28  ;;  %3153 = vmatprep.subr.bf16.mxu1 %v3523_v59  ;;  %v1123_v28 = vor.u32 %v1122_v46, %v291_v56  ;;  %v3557_v56 = vld [vmem:[%s4263_s1 + $0x388] sm:$0xff]  }
  0xa9   : > { %3293 = vmatprep.subr.bf16.mxu0 %v3524_v33  ;;  %3167 = vmatprep.mubr.bf16.mxu1 %v3881_v49  ;;  %v3530_v49 = vld [vmem:[%s4263_s1 + $0x320] sm:$0xff]  }
  0xaa   : > { %3307 = vmatprep.mubr.bf16.mxu0 %v3822_v29  ;;  %v3529_v29 = vld [vmem:[%s4263_s1 + $0x160] sm:$0xff]  }
  0xab   : > { %3154 = vmatpush3.bf16.msra.mxu1 %v3523_v59  ;;  %v1143_v59 = vsel %vm223_vm0, %v1123_v28, %v1136_v51  ;;  %v3562_v51 = vld [vmem:[%s4263_s1 + $0x3b0] sm:$0xff]  }
  0xac   : > { %3294 = vmatpush3.bf16.msra.mxu0 %v3524_v33  ;;  %3155 = vmatprep.subr.bf16.mxu1 %v3525_v48  ;;  %v3563_v33 = vld [vmem:[%s4263_s1 + $0x3b8] sm:$0xff]  }
  0xad   : > { %3295 = vmatprep.subr.bf16.mxu0 %v3526_v60 }
  0xaf   : > { %3156 = vmatpush3.bf16.msra.mxu1 %v3525_v48  ;;  %v2210_v48 = vrot.slane %v3928_v15, 2 }
  0xb0   : > { %3296 = vmatpush3.bf16.msra.mxu0 %v3526_v60  ;;  %3157 = vmatprep.subr.bf16.mxu1 %v3527_v34 }
  0xb1   : > { %3297 = vmatprep.subr.bf16.mxu0 %v3528_v62 }
  0xb3   : > { %3158 = vmatpush3.bf16.msra.mxu1 %v3527_v34 }
  0xb4   : > { %3298 = vmatpush3.bf16.msra.mxu0 %v3528_v62  ;;  %3159 = vmatprep.subr.bf16.mxu1 %v3529_v29 }
  0xb5   : > { %3299 = vmatprep.subr.bf16.mxu0 %v3530_v49 }
  0xb7   : > { %3160 = vmatpush3.bf16.msra.mxu1 %v3529_v29 }
  0xb8   : > { %3300 = vmatpush3.bf16.msra.mxu0 %v3530_v49  ;;  %3161 = vmatprep.subr.bf16.mxu1 %v3531_v0 }
  0xb9   : > { %3301 = vmatprep.subr.bf16.mxu0 %v3532_v1 }
  0xbb   : > { %3162 = vmatpush3.bf16.msra.mxu1 %v3531_v0 }
  0xbc   : > { %3302 = vmatpush3.bf16.msra.mxu0 %v3532_v1  ;;  %3163 = vmatprep.subr.bf16.mxu1 %v3533_v2 }
  0xbd   : > { %3303 = vmatprep.subr.bf16.mxu0 %v3534_v3 }
  0xbf   : > { %3164 = vmatpush3.bf16.msra.mxu1 %v3533_v2  ;;  %v2883_v2 = vld [vmem:[%s4264_s2] ss:$0 sm:$0xff] }
  0xc0   : > { %3304 = vmatpush3.bf16.msra.mxu0 %v3534_v3  ;;  %3165 = vmatprep.subr.bf16.mxu1 %v3535_v10 }
  0xc1   : > { %3305 = vmatprep.subr.bf16.mxu0 %v3536_v63 }
  0xc3   : > { %3166 = vmatpush3.bf16.msra.mxu1 %v3535_v10 }
  0xc4   : > { %3306 = vmatpush3.bf16.msra.mxu0 %v3536_v63  ;;  %3171 = vmatprep.subr.bf16.mxu1 %v3538_v21 }
  0xc5   : > { %3311 = vmatprep.subr.bf16.mxu0 %v3539_v27 }
  0xc6   : > { %3168 = vmatmul.mubr.bf16.vlgmr.msra.gmra.mrb[0].mxu1 %v995_v8 }
  0xc7   : > { %3172 = vmatpush3.bf16.msra.mxu1 %v3538_v21  ;;  %3308 = vmatmul.mubr.bf16.vlgmr.msra.gmra.mrb[0].mxu0 %v1952_v24 }
  0xc8   : > { %3312 = vmatpush3.bf16.msra.mxu0 %v3539_v27  ;;  %3173 = vmatprep.subr.bf16.mxu1 %v3542_v58 }
  0xc9   : > { %3313 = vmatprep.subr.bf16.mxu0 %v3543_v6  ;;  %3187 = vmatprep.mubr.bf16.mxu1 %v1139_v17 }
  0xca   : > { %3327 = vmatprep.mubr.bf16.mxu0 %v3847_v20  ;;  %v4183_v20 = vld [vmem:[%s3643_s14 + $0x2c] sm:$0x3] }
  0xcb   : > { %3174 = vmatpush3.bf16.msra.mxu1 %v3542_v58  ;;  %v2832_v5 = vcombine.low %v2805_v7, %v4183_v20 }
  0xcc   : > { %3314 = vmatpush3.bf16.msra.mxu0 %v3543_v6  ;;  %3175 = vmatprep.subr.bf16.mxu1 %v3544_v26 }
  0xcd   : > { %3315 = vmatprep.subr.bf16.mxu0 %v3545_v35  ;;  %v2080_v36 = vshrl.u32 %v2832_v5, 16  ;;  %v2083_v38 = vshll.u32 %v2832_v5, 16 }
  0xcf   : > { %3176 = vmatpush3.bf16.msra.mxu1 %v3544_v26  ;;  %v2082_v13 = vrot.slane %v2080_v36, 5  ;;  %v2085_v55 = vrot.slane %v2083_v38, 6 }
  0xd0   : > { %3316 = vmatpush3.bf16.msra.mxu0 %v3545_v35  ;;  %3177 = vmatprep.subr.bf16.mxu1 %v3546_v4 }
  0xd1   : > { %3317 = vmatprep.subr.bf16.mxu0 %v3547_v25  ;;  %v2086_v57 = vor.u32 %v2085_v55, %v2082_v13 }
  0xd3   : > { %3178 = vmatpush3.bf16.msra.mxu1 %v3546_v4  ;;  %v2089_v47 = vsel %vm223_vm0, %v2075_v54, %v2086_v57  ;;  %v2858_v54 = vcombine.low %v2857_v53, %v4183_v20 }
  0xd4   : > { %3318 = vmatpush3.bf16.msra.mxu0 %v3547_v25  ;;  %3179 = vmatprep.subr.bf16.mxu1 %v3548_v31 }
  0xd5   : > { %3319 = vmatprep.subr.bf16.mxu0 %v3549_v50  ;;  %v2214_v60 = vrot.slane %v2858_v54, 6 }
  0xd7   : > { %3180 = vmatpush3.bf16.msra.mxu1 %v3548_v31  ;;  %v2217_v34 = vsel %vm223_vm0, %v2210_v48, %v2214_v60 }
  0xd8   : > { %3320 = vmatpush3.bf16.msra.mxu0 %v3549_v50  ;;  %3181 = vmatprep.subr.bf16.mxu1 %v3550_v30 }
  0xd9   : > { %3321 = vmatprep.subr.bf16.mxu0 %v3551_v37 }
  0xdb   : > { %3182 = vmatpush3.bf16.msra.mxu1 %v3550_v30 }
  0xdc   : > { %3322 = vmatpush3.bf16.msra.mxu0 %v3551_v37  ;;  %3183 = vmatprep.subr.bf16.mxu1 %v3552_v45 }
  0xdd   : > { %3323 = vmatprep.subr.bf16.mxu0 %v3553_v39 }
  0xdf   : > { %3184 = vmatpush3.bf16.msra.mxu1 %v3552_v45 }
  0xe0   : > { %3324 = vmatpush3.bf16.msra.mxu0 %v3553_v39  ;;  %3185 = vmatprep.subr.bf16.mxu1 %v3554_v32 }
  0xe1   : > { %3325 = vmatprep.subr.bf16.mxu0 %v3555_v43 }
  0xe3   : > { %3186 = vmatpush3.bf16.msra.mxu1 %v3554_v32 }
  0xe4   : > { %3326 = vmatpush3.bf16.msra.mxu0 %v3555_v43 }
  0xe5   : > { %3331 = vmatprep.subr.bf16.mxu0 %v3556_v52 }
  0xe6   : > { %3188 = vmatmul.mubr.bf16.vlgmr.msra.gmra.mrb[0].mxu1 %v1143_v59 }
  0xe7   : > { %3328 = vmatmul.mubr.bf16.vlgmr.msra.gmra.mrb[0].mxu0 %v2089_v47 }
  0xe8   : > { %3332 = vmatpush3.bf16.msra.mxu0 %v3556_v52  ;;  %3347 = vmatprep.mubr.bf16.mxu0 %v3898_v61  ;;  %v3561_v61 = vld [vmem:[%s4263_s1 + $0x3a8] sm:$0xff]  }
  0xe9   : > { %3333 = vmatprep.subr.bf16.mxu0 %v3557_v56 }
  0xec   : > { %3334 = vmatpush3.bf16.msra.mxu0 %v3557_v56 }
  0xed   : > { %3335 = vmatprep.subr.bf16.mxu0 %v3558_v44 }
  0xf0   : > { %3336 = vmatpush3.bf16.msra.mxu0 %v3558_v44 }
  0xf1   : > { %3337 = vmatprep.subr.bf16.mxu0 %v3559_v42 }
  0xf4   : > { %3338 = vmatpush3.bf16.msra.mxu0 %v3559_v42 }
  0xf5   : > { %3339 = vmatprep.subr.bf16.mxu0 %v3560_v18 }
  0xf8   : > { %3340 = vmatpush3.bf16.msra.mxu0 %v3560_v18 }
  0xf9   : > { %3341 = vmatprep.subr.bf16.mxu0 %v3561_v61 }
  0xfc   : > { %3342 = vmatpush3.bf16.msra.mxu0 %v3561_v61 }
  0xfd   : > { %3343 = vmatprep.subr.bf16.mxu0 %v3562_v51 }
 0x100   : > { %3344 = vmatpush3.bf16.msra.mxu0 %v3562_v51 }
 0x101   : > { %3345 = vmatprep.subr.bf16.mxu0 %v3563_v33 }
 0x104   : > { %3346 = vmatpush3.bf16.msra.mxu0 %v3563_v33 }
 0x107   : > { %3348 = vmatmul.mubr.bf16.vlgmr.msra.gmra.mrb[0].mxu0 %v2217_v34 }
 0x1b9   : > { %v3189_v62 = vpop.f32.mrb[0].mxu1 }
 0x1ba   : > { %v1244_v29 = vpop.f32.mrb[1].mxu1 }
 0x1bb   : > { %v3190_v49 = vpop.f32.mrb[2].mxu1 }
 0x1bc   : > { %v1247_v0 = vpop.f32.mrb[3].mxu1 }
 0x1da   : > { %v3349_v1 = vpop.f32.mrb[0].mxu0 }
 0x1db   : > { %v3351_v3 = vadd.f32 %v3349_v1, %v3189_v62  ;;  %v2318_v7 = vpop.f32.mrb[1].mxu0 }
 0x1dc   : > { %v3352_v10 = vadd.f32 %v2318_v7, %v1244_v29  ;;  %v3350_v15 = vpop.f32.mrb[2].mxu0 }
 0x1dd   : > { %v2346_v11 = vadd.f32 %v3351_v3, %v2883_v2  ;;  %v3353_v63 = vadd.f32 %v3350_v15, %v3190_v49  ;;  %v2321_v9 = vpop.f32.mrb[3].mxu0 }
 0x1de   : > { %v2344_v16 = vadd.f32 %v3352_v10, %v2883_v2  ;;  %v3354_v19 = vadd.f32 %v2321_v9, %v1247_v0 }
 0x1df   : > { %v2347_v12 = vadd.f32 %v3353_v63, %v2883_v2  ;;  %v2350_v14 = vmax.f32 %v2346_v11, 0.0 }
 0x1e0   : > { %v2348_v21 = vmax.f32 %v2344_v16, 0.0  ;;  %v2345_v23 = vadd.f32 %v3354_v19, %v2883_v2 }
 0x1e1   : > { %v2351_v27 = vmax.f32 %v2347_v12, 0.0  ;;  %v2374_v6 = vmul.f32 %v2350_v14, %v2350_v14 }
 0x1e2   : > { %v2349_v22 = vmax.f32 %v2345_v23, 0.0  ;;  %v2372_v41 = vmul.f32 %v2348_v21, %v2348_v21 }
 0x1e3   : > { %v2898_v40 = vpack.c.bf16 %v2351_v27, %v2350_v14  ;;  %v2375_v35 = vmul.f32 %v2351_v27, %v2351_v27 }
 0x1e4   : > { %v2893_v8 = vpack.c.bf16 %v2349_v22, %v2348_v21  ;;  %v2363_v24 = vadd.f32 %v2349_v22, %v2348_v21  ;;  %v2373_v58 = vmul.f32 %v2349_v22, %v2349_v22 }
 0x1e5   : > { %2900 = vst [vmem:[%s204_s8 + $0x8] sm:$0xff] %v2898_v40  }
 0x1e6   : > { %2894 = vst [vmem:[%s204_s8] sm:$0xff] %v2893_v8   ;;  %v2364_v17 = vadd.f32 %v2363_v24, %v2350_v14  ;;  %v2376_v26 = vadd.f32 %v2373_v58, %v2372_v41 }
 0x1e8   : > { %v2365_v4 = vadd.f32 %v2364_v17, %v2351_v27  ;;  %v2377_v25 = vadd.f32 %v2376_v26, %v2374_v6 }
 0x1ea   : > { %v2366_v31 = vrot.slane %v2365_v4, 4  ;;  %v2378_v20 = vadd.f32 %v2377_v25, %v2375_v35 }
 0x1ec   : > { %v2367_v50 = vadd.f32 %v2366_v31, %v2365_v4  ;;  %v2379_v5 = vrot.slane %v2378_v20, 4 }
 0x1ee   : > { %v2368_v30 = vrot.slane %v2367_v50, 2  ;;  %v2380_v37 = vadd.f32 %v2379_v5, %v2378_v20 }
 0x1f0   : > { %v2369_v45 = vadd.f32 %v2368_v30, %v2367_v50  ;;  %v2381_v36 = vrot.slane %v2380_v37, 2 }
 0x1f2   : > { %v2370_v38 = vrot.slane %v2369_v45, 1  ;;  %v2382_v39 = vadd.f32 %v2381_v36, %v2380_v37 }
 0x1f4   : > { %v2383_v46 = vrot.slane %v2382_v39, 1  ;;  %v2371_v32 = vadd.f32 %v2370_v38, %v2369_v45 }
 0x1f6   : > { %v2384_v13 = vadd.f32 %v2383_v46, %v2382_v39 }
 0x1f8   : > { %v2386_v55 = vsel %vm2385_vm1, %v2371_v32, %v2384_v13 }
 0x1f9   : > { %2387 = vst [vmem:[%s208_s12] sm:$0x3] %v2386_v55 }
 0x1fa PF: > { %s15_s15 = sadd.s32 1, %s3572_s15  }
 0x1fb   : > { %p12_p4 = scmp.ge.s32.totalorder %s15_s15, 4  }
 0x1fd   :  { %14 = sbr.rel (!%p12_p4) target bundleno = 1 (0x1), region = 96 }

// kernel: input_downsampler_forward.3
= control target key start
LH: loop header
LB: loop body
LE: loop exit
PB: predicated region body
PF: predicated region fallthrough
CT: control target
= control target key end

     0   :  { %s449_s12 = smov 0   ;;  %s495_s0 = inlined_call_operand.vmem [shape: bf16[2,4,8,128], index: 0, kind: input, shape index: {}]   ;;  %s496_s1 = inlined_call_operand.vmem [shape: f32[1,128], index: 1, kind: input, shape index: {}]   ;;  %s497_s2 = inlined_call_operand.vmem [shape: f32[1,128], index: 2, kind: input, shape index: {}]   ;;  %s498_s3 = inlined_call_operand.vmem [shape: f32[2,4,3,128], index: 3, kind: output, shape index: {}]  }
   0x1 LB: > { %s379_s13 = sadd.s32 4294967295, %s425_s12   ;;  %p383_p0 = scmp.ge.s32.totalorder %s425_s12, 1  ;;  %s425_s12 = sphi %s449_s12, %s13_s12  }
   0x2   : > { %p137_p1 = scmp.lt.s32.totalorder %s425_s12, 3 }
   0x4   : > { %p138_p2 = pnand %p383_p0, %p137_p1 }
   0x5   : > { %p161_p3 = scmp.lt.s32.totalorder (!%p138_p2), %s379_s13, 1  ;;  %v388_v0 = vld [vmem:[%s496_s1] ss:$0 sm:$0xff] (!%p138_p2)  ;;  %vm218_vm0 = vcmask (!%p138_p2), 1040384   ;;  %vm220_vm1 = vcmask (!%p138_p2), 1041408   ;;  %s427_s22 = smov (!%p138_p2), 16  }
   0x6   : > { %141 = sbr.rel (%p138_p2) target bundleno = 172 (0xac), region = 32  ;;  %v389_v7 = vld [vmem:[%s497_s2] ss:$0 sm:$0xff] (!%p138_p2)  ;;  %s428_s23 = smov (!%p138_p2), 112   ;;  %vm226_vm2 = vcmask (!%p138_p2), 130048   ;;  %vm231_vm3 = vcmask (!%p138_p2), 916480  }
   0xd   : > { %s500_s13 = smov (!%p161_p3, %s379_s13), 1 }
   0xe   : > { %s398_s14 = sshll.u32 %s500_s13, 4 }
   0xf   : > { %s165_s17 = scalar_lea.vmem %s495_s0, %s398_s14  ;;  %s170_s26 = scalar_lea.vmem %s498_s3, %s398_s14 }
  0x10   : > { %v401_v1 = vld [vmem:[%s165_s17] sm:$0xff]   ;;  %v408_v2 = vld [vmem:[%s165_s17 + $0x8] sm:$0xff]  }
  0x11   : > { %v402_v3 = vunpack.c.l.bf16 %v401_v1  ;;  %v403_v4 = vunpack.c.h.bf16 %v401_v1  ;;  %v406_v5 = vunpack.c.l.bf16 %v408_v2  ;;  %v407_v6 = vunpack.c.h.bf16 %v408_v2 }
  0x13   : > { %v181_v8 = vmul.f32 %v402_v3, %v388_v0  ;;  %v192_v9 = vmul.f32 %v403_v4, %v388_v0  ;;  %v197_v10 = vmul.f32 %v406_v5, %v388_v0  ;;  %v202_v11 = vmul.f32 %v407_v6, %v388_v0 }
  0x15   : > { %v188_v12 = vadd.f32 %v389_v7, %v181_v8  ;;  %v193_v13 = vadd.f32 %v389_v7, %v192_v9  ;;  %v198_v14 = vadd.f32 %v389_v7, %v197_v10  ;;  %v203_v15 = vadd.f32 %v389_v7, %v202_v11 }
  0x17   : > { %v204_v16 = vmax.f32 %v188_v12, %v193_v13  ;;  %v265_v17 = vmax.f32 %v198_v14, %v193_v13  ;;  %v295_v18 = vmax.f32 %v203_v15, %v198_v14 }
  0x19   : > { %v206_v19 = vrot.slane %v204_v16, 1  ;;  %v236_v20 = vmax.f32 %v204_v16, %v198_v14  ;;  %v266_v21 = vmax.f32 %v265_v17, %v203_v15  ;;  %v297_v22 = vrot.slane %v295_v18, 1 }
  0x1b   : > { %v208_v23 = vmax.f32 %v204_v16, %v206_v19  ;;  %v238_v24 = vrot.slane %v236_v20, 1  ;;  %v268_v25 = vrot.slane %v266_v21, 1  ;;  %v299_v26 = vmax.f32 %v295_v18, %v297_v22 }
  0x1d   : > { %v210_v27 = vrot.slane %v208_v23, 1  ;;  %v240_v28 = vmax.f32 %v236_v20, %v238_v24  ;;  %v270_v29 = vmax.f32 %v266_v21, %v268_v25  ;;  %v301_v30 = vrot.slane %v299_v26, 1 }
  0x1f   : > { %v212_v31 = vmax.f32 %v204_v16, %v210_v27  ;;  %v242_v32 = vrot.slane %v240_v28, 1  ;;  %v272_v33 = vrot.slane %v270_v29, 1  ;;  %v303_v38 = vmax.f32 %v295_v18, %v301_v30 }
  0x21   : > { %v214_v34 = vrot.slane %v212_v31, 1  ;;  %v216_v35 = vrot.slane %v212_v31, 2  ;;  %v244_v36 = vmax.f32 %v236_v20, %v242_v32  ;;  %v274_v37 = vmax.f32 %v266_v21, %v272_v33 }
  0x22   : > { %v305_v48 = vrot.slane %v303_v38, 1  ;;  %v307_v50 = vrot.slane %v303_v38, 2 }
  0x23   : > { %v219_v39 = vsel %vm218_vm0, %v212_v31, %v214_v34  ;;  %v246_v40 = vrot.slane %v244_v36, 1  ;;  %v248_v41 = vrot.slane %v244_v36, 2  ;;  %v276_v42 = vrot.slane %v274_v37, 1 }
  0x24   : > { %v221_v43 = vsel %vm220_vm1, %v219_v39, %v216_v35  ;;  %v278_v46 = vrot.slane %v274_v37, 2  ;;  %v309_v51 = vsel %vm218_vm0, %v303_v38, %v305_v48 }
  0x25   : > { %223 = vrot.lane.b32.xlu0 %v221_v43, %s427_s22  ;;  %v250_v44 = vsel %vm218_vm0, %v244_v36, %v246_v40  ;;  %v280_v47 = vsel %vm218_vm0, %v274_v37, %v276_v42  ;;  %v310_v52 = vsel %vm220_vm1, %v309_v51, %v307_v50 }
  0x26   : > { %v251_v45 = vsel %vm220_vm1, %v250_v44, %v248_v41  ;;  %v281_v49 = vsel %vm220_vm1, %v280_v47, %v278_v46 }
  0x27   : > { %253 = vrot.lane.b32.xlu1 %v251_v45, %s427_s22 }
  0x29   : > { %228 = vrot.lane.b32.xlu0 %v221_v43, %s428_s23 }
  0x2b   : > { %257 = vrot.lane.b32.xlu1 %v251_v45, %s428_s23 }
  0x2d   : > { %283 = vrot.lane.b32.xlu0 %v281_v49, %s427_s22 }
  0x2f   : > { %287 = vrot.lane.b32.xlu1 %v281_v49, %s428_s23 }
  0x31   : > { %312 = vrot.lane.b32.xlu0 %v310_v52, %s427_s22 }
  0x33   : > { %316 = vrot.lane.b32.xlu1 %v310_v52, %s428_s23 }
  0x97   : > { %v224_v53 = vpop.permute.xlu0 %223 }
  0x98   : > { %v227_v56 = vsel %vm226_vm2, -inf, %v224_v53 }
  0x99   : > { %v254_v54 = vpop.permute.xlu1 %253 }
  0x9a   : > { %v256_v60 = vsel %vm226_vm2, -inf, %v254_v54 }
  0x9b   : > { %v229_v55 = vpop.permute.xlu0 %228 }
  0x9c   : > { %v232_v57 = vsel %vm231_vm3, %v229_v55, -inf }
  0x9d   : > { %v233_v58 = vmax.f32 %v227_v56, %v232_v57  ;;  %v258_v59 = vpop.permute.xlu1 %257 }
  0x9e   : > { %v260_v61 = vsel %vm231_vm3, %v258_v59, -inf }
  0x9f   : > { %v234_v62 = vmax.f32 %v221_v43, %v233_v58  ;;  %v261_v63 = vmax.f32 %v256_v60, %v260_v61  ;;  %v284_v0 = vpop.permute.xlu0 %283 }
  0xa0   : > { %v286_v1 = vsel %vm226_vm2, -inf, %v284_v0 }
  0xa1   : > { %235 = vst [vmem:[%s170_s26] sm:$0x7] %v234_v62  ;;  %v262_v2 = vmax.f32 %v251_v45, %v261_v63  ;;  %v288_v3 = vpop.permute.xlu1 %287 }
  0xa2   : > { %v290_v4 = vsel %vm231_vm3, %v288_v3, -inf }
  0xa3   : > { %393 = vst [vmem:[%s170_s26 + $0x4] sm:$0x7] %v262_v2  ;;  %v291_v5 = vmax.f32 %v286_v1, %v290_v4  ;;  %v313_v6 = vpop.permute.xlu0 %312 }
  0xa4   : > { %v315_v7 = vsel %vm226_vm2, -inf, %v313_v6 }
  0xa5   : > { %v292_v8 = vmax.f32 %v281_v49, %v291_v5  ;;  %v317_v9 = vpop.permute.xlu1 %316 }
  0xa6   : > { %v319_v10 = vsel %vm231_vm3, %v317_v9, -inf }
  0xa7   : > { %394 = vst [vmem:[%s170_s26 + $0x8] sm:$0x7] %v292_v8  ;;  %v320_v11 = vmax.f32 %v315_v7, %v319_v10 }
  0xa9   : > { %v321_v12 = vmax.f32 %v310_v52, %v320_v11 }
  0xab   : > { %395 = vst [vmem:[%s170_s26 + $0xc] sm:$0x7] %v321_v12 }
  0xac PF: > { %s13_s12 = sadd.s32 1, %s425_s12  }
  0xad   : > { %p10_p4 = scmp.ge.s32.totalorder %s13_s12, 4  }
  0xaf   :  { %12 = sbr.rel (!%p10_p4) target bundleno = 1 (0x1), region = 68 }

</bundles_post_ra>
